<compile_context>
chip_gen: v6e
topology: v6e:2x2x1
jax: 0.10.0
libtpu: 0.0.40
codegen_flags: <defaults>
</compile_context>

<pallas_src>
import functools
import math

import jax
import jax.numpy as jnp
from jax.experimental import pallas as pl
from jax.experimental.pallas import tpu as pltpu

LANE = 128   # f32 lane tile
SUB = 8      # f32 sublane tile

_VMEM = pl.BlockSpec(memory_space=pltpu.MemorySpace.VMEM)


# ----------------------------------------------------------------------------
# Fused Pallas kernel: 2-layer bidirectional LSTM (seq_len == 1) + Linear
# ----------------------------------------------------------------------------
def _fused_lstm_kernel(x_ref, h0_ref, c0_ref, w_ref, b_ref,
                       wlin_ref, blin_ref, out_ref):
    """Whole forward in VMEM.

    x_ref   : (8, 128)        input, batch/feature zero-padded
    h0_ref  : (4, 8, 128)     initial hidden states  [l0f, l0b, l1f, l1b]
    c0_ref  : (4, 8, 128)     initial cell states
    w_ref   : (4, 384, 512)   combined [in_a | in_b | h] -> gate weights,
                              each gate block padded to 128 lanes (bf16)
    b_ref   : (4, 8, 512)     b_ih + b_hh, gate-padded, sublane-broadcast (f32)
    wlin_ref: (256, 128)      linear weight, [h_fwd | h_bwd] -> out (bf16)
    blin_ref: (8, 128)        linear bias, sublane-broadcast (f32)
    out_ref : (8, 128)        padded output; real data in [:batch, :out_size]
    """
    num_layers = h0_ref.shape[0] // 2
    mm_dtype = w_ref.dtype

    in_a = x_ref[...]              # layer input, segment 0 (x / fwd hidden)
    in_b = jnp.zeros_like(in_a)    # layer input, segment 1 (bwd hidden; 0 at layer 0)

    for layer in range(num_layers):
        outs = []
        for direction in range(2):
            idx = layer * 2 + direction
            # Merged input+hidden matmul: (8,384) @ (384,512) on the MXU.
            z = jnp.concatenate([in_a, in_b, h0_ref[idx]], axis=-1)
            gates = jnp.dot(z.astype(mm_dtype), w_ref[idx],
                            preferred_element_type=jnp.float32) + b_ref[idx]
            # Each gate occupies a full 128-lane block -> whole-vreg slices.
            i_g = jax.nn.sigmoid(gates[:, 0 * LANE:1 * LANE])
            f_g = jax.nn.sigmoid(gates[:, 1 * LANE:2 * LANE])
            g_g = jnp.tanh(gates[:, 2 * LANE:3 * LANE])
            o_g = jax.nn.sigmoid(gates[:, 3 * LANE:4 * LANE])
            c_new = f_g * c0_ref[idx] + i_g * g_g        # f32 cell state
            outs.append(o_g * jnp.tanh(c_new))           # (8,128); pad lanes stay 0
        in_a, in_b = outs

    # nn.Dropout in eval mode is the identity -> go straight to the Linear.
    zo = jnp.concatenate([in_a, in_b], axis=-1)          # (8, 256)
    out_ref[...] = (
        jnp.dot(zo.astype(mm_dtype), wlin_ref[...],
                preferred_element_type=jnp.float32) + blin_ref[...]
    ).astype(out_ref.dtype)


# ----------------------------------------------------------------------------
# Parameter construction (PyTorch-style uniform init, PyTorch layouts)
# ----------------------------------------------------------------------------
def init_params(key, input_size, hidden_size, num_layers, output_size):
    bound = 1.0 / math.sqrt(hidden_size)
    layers = []
    for layer in range(num_layers):
        din = input_size if layer == 0 else 2 * hidden_size
        for _direction in range(2):  # forward, reverse
            key, k1, k2, k3, k4 = jax.random.split(key, 5)
            w_ih = jax.random.uniform(
                k1, (4 * hidden_size, din), jnp.float32, -bound, bound)
            w_hh = jax.random.uniform(
                k2, (4 * hidden_size, hidden_size), jnp.float32, -bound, bound)
            b_ih = jax.random.uniform(
                k3, (4 * hidden_size,), jnp.float32, -bound, bound)
            b_hh = jax.random.uniform(
                k4, (4 * hidden_size,), jnp.float32, -bound, bound)
            layers.append((w_ih, w_hh, b_ih + b_hh))

    fan_in = 2 * hidden_size
    lb = 1.0 / math.sqrt(fan_in)
    key, kw, kb = jax.random.split(key, 3)
    w_lin = jax.random.uniform(kw, (output_size, fan_in), jnp.float32, -lb, lb)
    b_lin = jax.random.uniform(kb, (output_size,), jnp.float32, -lb, lb)
    return layers, (w_lin, b_lin)


def pack_params(layers, linear, input_size, hidden_size, num_layers,
                output_size, weight_dtype=jnp.bfloat16):
    """Build padded / stacked / pre-transposed kernel operands."""
    H = hidden_size
    n = num_layers * 2

    # Combined LSTM weights: rows [0:128) <- segment "in_a", [128:256) <- "in_b",
    # [256:384) <- h0.  Columns: gate k occupies [k*128 : k*128+H), rest zero.
    w_all = jnp.zeros((n, 3 * LANE, 4 * LANE), jnp.float32)
    b_all = jnp.zeros((n, 4 * LANE), jnp.float32)
    for idx, (w_ih, w_hh, b) in enumerate(layers):
        layer = idx // 2
        din = input_size if layer == 0 else 2 * H
        wih_t = w_ih.T   # (din, 4H)
        whh_t = w_hh.T   # (H,   4H)
        for k in range(4):  # gates i, f, g, o
            col = slice(k * LANE, k * LANE + H)
            gc = slice(k * H, (k + 1) * H)
            if layer == 0:
                w_all = w_all.at[idx, 0:din, col].set(wih_t[:, gc])
            else:
                # layer-1 input = concat(h_fwd, h_bwd): split across segments
                w_all = w_all.at[idx, 0:H, col].set(wih_t[0:H, gc])
                w_all = w_all.at[idx, LANE:LANE + H, col].set(wih_t[H:2 * H, gc])
            w_all = w_all.at[idx, 2 * LANE:2 * LANE + H, col].set(whh_t[:, gc])
            b_all = b_all.at[idx, col].set(b[gc])
    b_all = jnp.tile(b_all[:, None, :], (1, SUB, 1))      # (n, 8, 512)

    w_lin, b_lin = linear
    wlin_t = w_lin.T                                      # (2H, out)
    wlin_pad = jnp.zeros((2 * LANE, LANE), jnp.float32)
    wlin_pad = wlin_pad.at[0:H, 0:output_size].set(wlin_t[0:H])
    wlin_pad = wlin_pad.at[LANE:LANE + H, 0:output_size].set(wlin_t[H:2 * H])
    blin_pad = jnp.zeros((LANE,), jnp.float32).at[0:output_size].set(b_lin)
    blin_pad = jnp.tile(blin_pad[None, :], (SUB, 1))      # (8, 128)

    return dict(
        w=w_all.astype(weight_dtype),
        b=b_all,
        w_lin=wlin_pad.astype(weight_dtype),
        b_lin=blin_pad,
    )


# ----------------------------------------------------------------------------
# Forward pass wrapper (single fused pallas_call)
# ----------------------------------------------------------------------------
@functools.partial(jax.jit, static_argnames=("output_size",))
def lstm_forward(x, h0, c0, packed, output_size):
    """x: (batch, input_size) -> (batch, output_size)."""
    B, Din = x.shape
    n, _, H = h0.shape
    x_p = jnp.zeros((SUB, LANE), jnp.float32).at[:B, :Din].set(x)
    h0_p = jnp.zeros((n, SUB, LANE), jnp.float32).at[:, :B, :H].set(h0)
    c0_p = jnp.zeros((n, SUB, LANE), jnp.float32).at[:, :B, :H].set(c0)

    out_p = pl.pallas_call(
        _fused_lstm_kernel,
        out_shape=jax.ShapeDtypeStruct((SUB, LANE), jnp.float32),
        in_specs=[_VMEM] * 7,
        out_specs=_VMEM,
        compiler_params=pltpu.CompilerParams(vmem_limit_bytes=32 * 1024 * 1024),
    )(x_p, h0_p, c0_p, packed["w"], packed["b"],
      packed["w_lin"], packed["b_lin"])

    return out_p[:B, :output_size]


# ----------------------------------------------------------------------------
# Pure-JAX reference (f32) for a correctness sanity check
# ----------------------------------------------------------------------------
def lstm_forward_ref(x, h0, c0, layers, linear, num_layers, hidden_size):
    H = hidden_size
    layer_in = x
    for layer in range(num_layers):
        outs = []
        for d in range(2):
            idx = layer * 2 + d
            w_ih, w_hh, b = layers[idx]
            gates = layer_in @ w_ih.T + h0[idx] @ w_hh.T + b
            i = jax.nn.sigmoid(gates[:, 0 * H:1 * H])
            f = jax.nn.sigmoid(gates[:, 1 * H:2 * H])
            g = jnp.tanh(gates[:, 2 * H:3 * H])
            o = jax.nn.sigmoid(gates[:, 3 * H:4 * H])
            c_new = f * c0[idx] + i * g
            outs.append(o * jnp.tanh(c_new))
        layer_in = jnp.concatenate(outs, axis=-1)
    w_lin, b_lin = linear
    return layer_in @ w_lin.T + b_lin


# ----------------------------------------------------------------------------
if __name__ == "__main__":
    input_size = 16
    hidden_size = 32
    num_layers = 2
    output_size = 8
    batch = 2
    num_directions = 2

    key = jax.random.PRNGKey(0)
    kx, kh, kc, kp = jax.random.split(key, 4)

    # module input: (batch, input_size); unsqueezed to seq_len=1 internally
    x = jax.random.normal(kx, (batch, input_size), jnp.float32)

    # h_0 / c_0 are drawn randomly in the PyTorch forward (torch.randn);
    # drawn deterministically here with JAX PRNG.
    h0 = jax.random.normal(
        kh, (num_directions * num_layers, batch, hidden_size), jnp.float32)
    c0 = jax.random.normal(
        kc, (num_directions * num_layers, batch, hidden_size), jnp.float32)

    layers, lin = init_params(kp, input_size, hidden_size, num_layers,
                              output_size)
    packed = pack_params(layers, lin, input_size, hidden_size, num_layers,
                         output_size, weight_dtype=jnp.bfloat16)

    out = lstm_forward(x, h0, c0, packed, output_size)
    out = jax.block_until_ready(out)

    assert out.shape == (batch, output_size), out.shape
    assert out.dtype == jnp.float32

    ref = lstm_forward_ref(x, h0, c0, layers, lin, num_layers, hidden_size)
    assert bool(jnp.all(jnp.isfinite(out)))
    # bf16 matmul operands -> loose tolerance vs. the f32 reference.
    assert bool(jnp.allclose(out, ref, atol=5e-2, rtol=5e-2)), (out, ref)

    print("KERNEL_OK")
</pallas_src>

<mosaic_0001>
module attributes {stable_mosaic.version = 11 : i64} {
  func.func @_fused_lstm_kernel(%arg0: memref<8x128xf32, #tpu.memory_space<vmem>>, %arg1: memref<4x8x128xf32, #tpu.memory_space<vmem>>, %arg2: memref<4x8x128xf32, #tpu.memory_space<vmem>>, %arg3: memref<4x384x512xbf16, #tpu.memory_space<vmem>>, %arg4: memref<4x8x512xf32, #tpu.memory_space<vmem>>, %arg5: memref<256x128xbf16, #tpu.memory_space<vmem>>, %arg6: memref<8x128xf32, #tpu.memory_space<vmem>>, %arg7: memref<8x128xf32, #tpu.memory_space<vmem>>) attributes {dimension_semantics = [], scalar_prefetch = 0 : i64, scratch_operands = 0 : i64, tpu.core_type = #tpu.core_type<tc>} {
    %c0 = arith.constant 0 : index
    %c0_0 = arith.constant 0 : index
    %0 = vector.load %arg0[%c0, %c0_0] : memref<8x128xf32, #tpu.memory_space<vmem>>, vector<8x128xf32>
    %cst = arith.constant 0.000000e+00 : f32
    %1 = vector.broadcast %cst : f32 to vector<8x128xf32>
    %c0_1 = arith.constant 0 : index
    %c0_2 = arith.constant 0 : index
    %c0_3 = arith.constant 0 : index
    %2 = vector.load %arg1[%c0_1, %c0_2, %c0_3] : memref<4x8x128xf32, #tpu.memory_space<vmem>>, vector<1x8x128xf32>
    %3 = vector.shape_cast %2 : vector<1x8x128xf32> to vector<8x128xf32>
    %4 = tpu.concatenate %0, %1, %3 in 1 : vector<8x128xf32>, vector<8x128xf32>, vector<8x128xf32> -> vector<8x384xf32>
    %5 = arith.truncf %4 : vector<8x384xf32> to vector<8x384xbf16>
    %c0_4 = arith.constant 0 : index
    %c0_5 = arith.constant 0 : index
    %c0_6 = arith.constant 0 : index
    %6 = vector.load %arg3[%c0_4, %c0_5, %c0_6] : memref<4x384x512xbf16, #tpu.memory_space<vmem>>, vector<1x384x512xbf16>
    %7 = vector.shape_cast %6 : vector<1x384x512xbf16> to vector<384x512xbf16>
    %cst_7 = arith.constant dense<0.000000e+00> : vector<8x512xf32>
    %8 = tpu.matmul %5, %7, %cst_7 {dimension_numbers = #tpu.dot_dimension_numbers<[1], [0], [0], [1], [0, 0, 1, 1], [], []>} : vector<8x384xbf16>, vector<384x512xbf16>, vector<8x512xf32> -> vector<8x512xf32>
    %c0_8 = arith.constant 0 : index
    %c0_9 = arith.constant 0 : index
    %c0_10 = arith.constant 0 : index
    %9 = vector.load %arg4[%c0_8, %c0_9, %c0_10] : memref<4x8x512xf32, #tpu.memory_space<vmem>>, vector<1x8x512xf32>
    %10 = vector.shape_cast %9 : vector<1x8x512xf32> to vector<8x512xf32>
    %11 = arith.addf %8, %10 : vector<8x512xf32>
    %12 = vector.extract_strided_slice %11 {offsets = [0, 0], sizes = [8, 128], strides = [1, 1]} : vector<8x512xf32> to vector<8x128xf32>
    %13 = arith.negf %12 : vector<8x128xf32>
    %14 = math.exp %13 : vector<8x128xf32>
    %cst_11 = arith.constant 1.000000e+00 : f32
    %15 = vector.broadcast %cst_11 : f32 to vector<8x128xf32>
    %16 = arith.addf %15, %14 : vector<8x128xf32>
    %17 = arith.divf %15, %16 : vector<8x128xf32>
    %18 = vector.extract_strided_slice %11 {offsets = [0, 128], sizes = [8, 128], strides = [1, 1]} : vector<8x512xf32> to vector<8x128xf32>
    %19 = arith.negf %18 : vector<8x128xf32>
    %20 = math.exp %19 : vector<8x128xf32>
    %cst_12 = arith.constant 1.000000e+00 : f32
    %21 = vector.broadcast %cst_12 : f32 to vector<8x128xf32>
    %22 = arith.addf %21, %20 : vector<8x128xf32>
    %23 = arith.divf %21, %22 : vector<8x128xf32>
    %24 = vector.extract_strided_slice %11 {offsets = [0, 256], sizes = [8, 128], strides = [1, 1]} : vector<8x512xf32> to vector<8x128xf32>
    %25 = math.tanh %24 : vector<8x128xf32>
    %26 = vector.extract_strided_slice %11 {offsets = [0, 384], sizes = [8, 128], strides = [1, 1]} : vector<8x512xf32> to vector<8x128xf32>
    %27 = arith.negf %26 : vector<8x128xf32>
    %28 = math.exp %27 : vector<8x128xf32>
    %cst_13 = arith.constant 1.000000e+00 : f32
    %29 = vector.broadcast %cst_13 : f32 to vector<8x128xf32>
    %30 = arith.addf %29, %28 : vector<8x128xf32>
    %31 = arith.divf %29, %30 : vector<8x128xf32>
    %c0_14 = arith.constant 0 : index
    %c0_15 = arith.constant 0 : index
    %c0_16 = arith.constant 0 : index
    %32 = vector.load %arg2[%c0_14, %c0_15, %c0_16] : memref<4x8x128xf32, #tpu.memory_space<vmem>>, vector<1x8x128xf32>
    %33 = vector.shape_cast %32 : vector<1x8x128xf32> to vector<8x128xf32>
    %34 = arith.mulf %23, %33 : vector<8x128xf32>
    %35 = arith.mulf %17, %25 : vector<8x128xf32>
    %36 = arith.addf %34, %35 : vector<8x128xf32>
    %37 = math.tanh %36 : vector<8x128xf32>
    %38 = arith.mulf %31, %37 : vector<8x128xf32>
    %c1 = arith.constant 1 : index
    %c0_17 = arith.constant 0 : index
    %c0_18 = arith.constant 0 : index
    %39 = vector.load %arg1[%c1, %c0_17, %c0_18] : memref<4x8x128xf32, #tpu.memory_space<vmem>>, vector<1x8x128xf32>
    %40 = vector.shape_cast %39 : vector<1x8x128xf32> to vector<8x128xf32>
    %41 = tpu.concatenate %0, %1, %40 in 1 : vector<8x128xf32>, vector<8x128xf32>, vector<8x128xf32> -> vector<8x384xf32>
    %42 = arith.truncf %41 : vector<8x384xf32> to vector<8x384xbf16>
    %c1_19 = arith.constant 1 : index
    %c0_20 = arith.constant 0 : index
    %c0_21 = arith.constant 0 : index
    %43 = vector.load %arg3[%c1_19, %c0_20, %c0_21] : memref<4x384x512xbf16, #tpu.memory_space<vmem>>, vector<1x384x512xbf16>
    %44 = vector.shape_cast %43 : vector<1x384x512xbf16> to vector<384x512xbf16>
    %cst_22 = arith.constant dense<0.000000e+00> : vector<8x512xf32>
    %45 = tpu.matmul %42, %44, %cst_22 {dimension_numbers = #tpu.dot_dimension_numbers<[1], [0], [0], [1], [0, 0, 1, 1], [], []>} : vector<8x384xbf16>, vector<384x512xbf16>, vector<8x512xf32> -> vector<8x512xf32>
    %c1_23 = arith.constant 1 : index
    %c0_24 = arith.constant 0 : index
    %c0_25 = arith.constant 0 : index
    %46 = vector.load %arg4[%c1_23, %c0_24, %c0_25] : memref<4x8x512xf32, #tpu.memory_space<vmem>>, vector<1x8x512xf32>
    %47 = vector.shape_cast %46 : vector<1x8x512xf32> to vector<8x512xf32>
    %48 = arith.addf %45, %47 : vector<8x512xf32>
    %49 = vector.extract_strided_slice %48 {offsets = [0, 0], sizes = [8, 128], strides = [1, 1]} : vector<8x512xf32> to vector<8x128xf32>
    %50 = arith.negf %49 : vector<8x128xf32>
    %51 = math.exp %50 : vector<8x128xf32>
    %cst_26 = arith.constant 1.000000e+00 : f32
    %52 = vector.broadcast %cst_26 : f32 to vector<8x128xf32>
    %53 = arith.addf %52, %51 : vector<8x128xf32>
    %54 = arith.divf %52, %53 : vector<8x128xf32>
    %55 = vector.extract_strided_slice %48 {offsets = [0, 128], sizes = [8, 128], strides = [1, 1]} : vector<8x512xf32> to vector<8x128xf32>
    %56 = arith.negf %55 : vector<8x128xf32>
    %57 = math.exp %56 : vector<8x128xf32>
    %cst_27 = arith.constant 1.000000e+00 : f32
    %58 = vector.broadcast %cst_27 : f32 to vector<8x128xf32>
    %59 = arith.addf %58, %57 : vector<8x128xf32>
    %60 = arith.divf %58, %59 : vector<8x128xf32>
    %61 = vector.extract_strided_slice %48 {offsets = [0, 256], sizes = [8, 128], strides = [1, 1]} : vector<8x512xf32> to vector<8x128xf32>
    %62 = math.tanh %61 : vector<8x128xf32>
    %63 = vector.extract_strided_slice %48 {offsets = [0, 384], sizes = [8, 128], strides = [1, 1]} : vector<8x512xf32> to vector<8x128xf32>
    %64 = arith.negf %63 : vector<8x128xf32>
    %65 = math.exp %64 : vector<8x128xf32>
    %cst_28 = arith.constant 1.000000e+00 : f32
    %66 = vector.broadcast %cst_28 : f32 to vector<8x128xf32>
    %67 = arith.addf %66, %65 : vector<8x128xf32>
    %68 = arith.divf %66, %67 : vector<8x128xf32>
    %c1_29 = arith.constant 1 : index
    %c0_30 = arith.constant 0 : index
    %c0_31 = arith.constant 0 : index
    %69 = vector.load %arg2[%c1_29, %c0_30, %c0_31] : memref<4x8x128xf32, #tpu.memory_space<vmem>>, vector<1x8x128xf32>
    %70 = vector.shape_cast %69 : vector<1x8x128xf32> to vector<8x128xf32>
    %71 = arith.mulf %60, %70 : vector<8x128xf32>
    %72 = arith.mulf %54, %62 : vector<8x128xf32>
    %73 = arith.addf %71, %72 : vector<8x128xf32>
    %74 = math.tanh %73 : vector<8x128xf32>
    %75 = arith.mulf %68, %74 : vector<8x128xf32>
    %c2 = arith.constant 2 : index
    %c0_32 = arith.constant 0 : index
    %c0_33 = arith.constant 0 : index
    %76 = vector.load %arg1[%c2, %c0_32, %c0_33] : memref<4x8x128xf32, #tpu.memory_space<vmem>>, vector<1x8x128xf32>
    %77 = vector.shape_cast %76 : vector<1x8x128xf32> to vector<8x128xf32>
    %78 = tpu.concatenate %38, %75, %77 in 1 : vector<8x128xf32>, vector<8x128xf32>, vector<8x128xf32> -> vector<8x384xf32>
    %79 = arith.truncf %78 : vector<8x384xf32> to vector<8x384xbf16>
    %c2_34 = arith.constant 2 : index
    %c0_35 = arith.constant 0 : index
    %c0_36 = arith.constant 0 : index
    %80 = vector.load %arg3[%c2_34, %c0_35, %c0_36] : memref<4x384x512xbf16, #tpu.memory_space<vmem>>, vector<1x384x512xbf16>
    %81 = vector.shape_cast %80 : vector<1x384x512xbf16> to vector<384x512xbf16>
    %cst_37 = arith.constant dense<0.000000e+00> : vector<8x512xf32>
    %82 = tpu.matmul %79, %81, %cst_37 {dimension_numbers = #tpu.dot_dimension_numbers<[1], [0], [0], [1], [0, 0, 1, 1], [], []>} : vector<8x384xbf16>, vector<384x512xbf16>, vector<8x512xf32> -> vector<8x512xf32>
    %c2_38 = arith.constant 2 : index
    %c0_39 = arith.constant 0 : index
    %c0_40 = arith.constant 0 : index
    %83 = vector.load %arg4[%c2_38, %c0_39, %c0_40] : memref<4x8x512xf32, #tpu.memory_space<vmem>>, vector<1x8x512xf32>
    %84 = vector.shape_cast %83 : vector<1x8x512xf32> to vector<8x512xf32>
    %85 = arith.addf %82, %84 : vector<8x512xf32>
    %86 = vector.extract_strided_slice %85 {offsets = [0, 0], sizes = [8, 128], strides = [1, 1]} : vector<8x512xf32> to vector<8x128xf32>
    %87 = arith.negf %86 : vector<8x128xf32>
    %88 = math.exp %87 : vector<8x128xf32>
    %cst_41 = arith.constant 1.000000e+00 : f32
    %89 = vector.broadcast %cst_41 : f32 to vector<8x128xf32>
    %90 = arith.addf %89, %88 : vector<8x128xf32>
    %91 = arith.divf %89, %90 : vector<8x128xf32>
    %92 = vector.extract_strided_slice %85 {offsets = [0, 128], sizes = [8, 128], strides = [1, 1]} : vector<8x512xf32> to vector<8x128xf32>
    %93 = arith.negf %92 : vector<8x128xf32>
    %94 = math.exp %93 : vector<8x128xf32>
    %cst_42 = arith.constant 1.000000e+00 : f32
    %95 = vector.broadcast %cst_42 : f32 to vector<8x128xf32>
    %96 = arith.addf %95, %94 : vector<8x128xf32>
    %97 = arith.divf %95, %96 : vector<8x128xf32>
    %98 = vector.extract_strided_slice %85 {offsets = [0, 256], sizes = [8, 128], strides = [1, 1]} : vector<8x512xf32> to vector<8x128xf32>
    %99 = math.tanh %98 : vector<8x128xf32>
    %100 = vector.extract_strided_slice %85 {offsets = [0, 384], sizes = [8, 128], strides = [1, 1]} : vector<8x512xf32> to vector<8x128xf32>
    %101 = arith.negf %100 : vector<8x128xf32>
    %102 = math.exp %101 : vector<8x128xf32>
    %cst_43 = arith.constant 1.000000e+00 : f32
    %103 = vector.broadcast %cst_43 : f32 to vector<8x128xf32>
    %104 = arith.addf %103, %102 : vector<8x128xf32>
    %105 = arith.divf %103, %104 : vector<8x128xf32>
    %c2_44 = arith.constant 2 : index
    %c0_45 = arith.constant 0 : index
    %c0_46 = arith.constant 0 : index
    %106 = vector.load %arg2[%c2_44, %c0_45, %c0_46] : memref<4x8x128xf32, #tpu.memory_space<vmem>>, vector<1x8x128xf32>
    %107 = vector.shape_cast %106 : vector<1x8x128xf32> to vector<8x128xf32>
    %108 = arith.mulf %97, %107 : vector<8x128xf32>
    %109 = arith.mulf %91, %99 : vector<8x128xf32>
    %110 = arith.addf %108, %109 : vector<8x128xf32>
    %111 = math.tanh %110 : vector<8x128xf32>
    %112 = arith.mulf %105, %111 : vector<8x128xf32>
    %c3 = arith.constant 3 : index
    %c0_47 = arith.constant 0 : index
    %c0_48 = arith.constant 0 : index
    %113 = vector.load %arg1[%c3, %c0_47, %c0_48] : memref<4x8x128xf32, #tpu.memory_space<vmem>>, vector<1x8x128xf32>
    %114 = vector.shape_cast %113 : vector<1x8x128xf32> to vector<8x128xf32>
    %115 = tpu.concatenate %38, %75, %114 in 1 : vector<8x128xf32>, vector<8x128xf32>, vector<8x128xf32> -> vector<8x384xf32>
    %116 = arith.truncf %115 : vector<8x384xf32> to vector<8x384xbf16>
    %c3_49 = arith.constant 3 : index
    %c0_50 = arith.constant 0 : index
    %c0_51 = arith.constant 0 : index
    %117 = vector.load %arg3[%c3_49, %c0_50, %c0_51] : memref<4x384x512xbf16, #tpu.memory_space<vmem>>, vector<1x384x512xbf16>
    %118 = vector.shape_cast %117 : vector<1x384x512xbf16> to vector<384x512xbf16>
    %cst_52 = arith.constant dense<0.000000e+00> : vector<8x512xf32>
    %119 = tpu.matmul %116, %118, %cst_52 {dimension_numbers = #tpu.dot_dimension_numbers<[1], [0], [0], [1], [0, 0, 1, 1], [], []>} : vector<8x384xbf16>, vector<384x512xbf16>, vector<8x512xf32> -> vector<8x512xf32>
    %c3_53 = arith.constant 3 : index
    %c0_54 = arith.constant 0 : index
    %c0_55 = arith.constant 0 : index
    %120 = vector.load %arg4[%c3_53, %c0_54, %c0_55] : memref<4x8x512xf32, #tpu.memory_space<vmem>>, vector<1x8x512xf32>
    %121 = vector.shape_cast %120 : vector<1x8x512xf32> to vector<8x512xf32>
    %122 = arith.addf %119, %121 : vector<8x512xf32>
    %123 = vector.extract_strided_slice %122 {offsets = [0, 0], sizes = [8, 128], strides = [1, 1]} : vector<8x512xf32> to vector<8x128xf32>
    %124 = arith.negf %123 : vector<8x128xf32>
    %125 = math.exp %124 : vector<8x128xf32>
    %cst_56 = arith.constant 1.000000e+00 : f32
    %126 = vector.broadcast %cst_56 : f32 to vector<8x128xf32>
    %127 = arith.addf %126, %125 : vector<8x128xf32>
    %128 = arith.divf %126, %127 : vector<8x128xf32>
    %129 = vector.extract_strided_slice %122 {offsets = [0, 128], sizes = [8, 128], strides = [1, 1]} : vector<8x512xf32> to vector<8x128xf32>
    %130 = arith.negf %129 : vector<8x128xf32>
    %131 = math.exp %130 : vector<8x128xf32>
    %cst_57 = arith.constant 1.000000e+00 : f32
    %132 = vector.broadcast %cst_57 : f32 to vector<8x128xf32>
    %133 = arith.addf %132, %131 : vector<8x128xf32>
    %134 = arith.divf %132, %133 : vector<8x128xf32>
    %135 = vector.extract_strided_slice %122 {offsets = [0, 256], sizes = [8, 128], strides = [1, 1]} : vector<8x512xf32> to vector<8x128xf32>
    %136 = math.tanh %135 : vector<8x128xf32>
    %137 = vector.extract_strided_slice %122 {offsets = [0, 384], sizes = [8, 128], strides = [1, 1]} : vector<8x512xf32> to vector<8x128xf32>
    %138 = arith.negf %137 : vector<8x128xf32>
    %139 = math.exp %138 : vector<8x128xf32>
    %cst_58 = arith.constant 1.000000e+00 : f32
    %140 = vector.broadcast %cst_58 : f32 to vector<8x128xf32>
    %141 = arith.addf %140, %139 : vector<8x128xf32>
    %142 = arith.divf %140, %141 : vector<8x128xf32>
    %c3_59 = arith.constant 3 : index
    %c0_60 = arith.constant 0 : index
    %c0_61 = arith.constant 0 : index
    %143 = vector.load %arg2[%c3_59, %c0_60, %c0_61] : memref<4x8x128xf32, #tpu.memory_space<vmem>>, vector<1x8x128xf32>
    %144 = vector.shape_cast %143 : vector<1x8x128xf32> to vector<8x128xf32>
    %145 = arith.mulf %134, %144 : vector<8x128xf32>
    %146 = arith.mulf %128, %136 : vector<8x128xf32>
    %147 = arith.addf %145, %146 : vector<8x128xf32>
    %148 = math.tanh %147 : vector<8x128xf32>
    %149 = arith.mulf %142, %148 : vector<8x128xf32>
    %150 = tpu.concatenate %112, %149 in 1 : vector<8x128xf32>, vector<8x128xf32> -> vector<8x256xf32>
    %151 = arith.truncf %150 : vector<8x256xf32> to vector<8x256xbf16>
    %c0_62 = arith.constant 0 : index
    %c0_63 = arith.constant 0 : index
    %152 = vector.load %arg5[%c0_62, %c0_63] : memref<256x128xbf16, #tpu.memory_space<vmem>>, vector<256x128xbf16>
    %cst_64 = arith.constant dense<0.000000e+00> : vector<8x128xf32>
    %153 = tpu.matmul %151, %152, %cst_64 {dimension_numbers = #tpu.dot_dimension_numbers<[1], [0], [0], [1], [0, 0, 1, 1], [], []>} : vector<8x256xbf16>, vector<256x128xbf16>, vector<8x128xf32> -> vector<8x128xf32>
    %c0_65 = arith.constant 0 : index
    %c0_66 = arith.constant 0 : index
    %154 = vector.load %arg6[%c0_65, %c0_66] : memref<8x128xf32, #tpu.memory_space<vmem>>, vector<8x128xf32>
    %155 = arith.addf %153, %154 : vector<8x128xf32>
    %c0_67 = arith.constant 0 : index
    %c0_68 = arith.constant 0 : index
    %156 = vector.load %arg7[%c0_67, %c0_68] : memref<8x128xf32, #tpu.memory_space<vmem>>, vector<8x128xf32>
    tpu.vector_store %arg7[%c0_67, %c0_68], %155 {strides = array<i32>} : memref<8x128xf32, #tpu.memory_space<vmem>>, vector<8x128xf32>,
    return
  }
}

</mosaic_0001>

<bundles_post_ra>
// kernel: lstm_forward.1
= control target key start
LH: loop header
LB: loop body
LE: loop exit
PB: predicated region body
PF: predicated region fallthrough
CT: control target
= control target key end

     0   :  { %12 = vsyncpa [#allocation3], 0  ;;  %s4706_s0 = inlined_call_operand.vmem [shape: f32[8,128], index: 0, kind: input, shape index: {}]   ;;  %s4707_s1 = inlined_call_operand.vmem [shape: f32[4,8,128], index: 1, kind: input, shape index: {}]   ;;  %s4708_s2 = inlined_call_operand.vmem [shape: f32[4,8,128], index: 2, kind: input, shape index: {}]   ;;  %s4709_s3 = inlined_call_operand.hbm [shape: bf16[4,384,512], index: 3, kind: input, shape index: {}]   ;;  %s4710_s4 = inlined_call_operand.hbm [shape: f32[4,8,512], index: 4, kind: input, shape index: {}]   ;;  %s4711_s5 = inlined_call_operand.hbm [shape: bf16[256,128], index: 5, kind: input, shape index: {}]   ;;  %s4712_s6 = inlined_call_operand.hbm [shape: f32[8,128], index: 6, kind: input, shape index: {}]   ;;  %s4713_s7 = inlined_call_operand.vmem [shape: f32[8,128], index: 7, kind: output, shape index: {}]  }
   0x1   :  { %13 = vsyncpa [#allocation5], 0 }
   0x2   :  { %14 = vsyncpa [#allocation8], 0  ;;  %s4554_s24 = smov [#allocation4]  }
   0x3   :  { %s38_s25 = sshll.u32 %s4554_s24, 4  ;;  %s39_s25 = int_to_ptr.vmem [resolvable:$true] %s38_s25 }
   0x4   :  { %s4476_s26 = scalar_lea.vmem %s39_s25, 2048  ;;  %p4481_p1 = scmp.lt.s32.totalorder %s39_s25, %s39_s25 }
   0x5   :  { %p4477_p0 = scmp.ne.s32.totalorder %s39_s25, %s4476_s26  ;;  %p4482_p2 = scmp.lt.s32.totalorder %s4476_s26, %s4476_s26 }
   0x7   :  { %p4483_p3 = por %p4482_p2, %p4481_p1 }
   0x9   :  { %p4484_p4 = pnand %p4483_p3, %p4477_p0 }
   0xb   :  { %4487 = shalt.err (!%p4484_p4)
}
   0xc   :  { %s4555_s27 = smov 512   ;;  %s4556_s28 = smov 32  }
   0xd   :  { %44 = dma.hbm_to_vmem [thread:$0]  %s4710_s4, 2048, %s39_s25, [#allocation5], %s4555_s27, %s4555_s27, %s4556_s28  }
   0xe   :  { %s4557_s8 = smov [#allocation2]  }
   0xf   :  { %s26_s9 = sshll.u32 %s4557_s8, 4  ;;  %s27_s9 = int_to_ptr.vmem [resolvable:$true] %s26_s9 }
  0x10   :  { %s4496_s10 = scalar_lea.vmem %s27_s9, 49152  ;;  %p4501_p6 = scmp.lt.s32.totalorder %s27_s9, %s27_s9 }
  0x11   :  { %p4497_p5 = scmp.ne.s32.totalorder %s27_s9, %s4496_s10  ;;  %p4502_p7 = scmp.lt.s32.totalorder %s4496_s10, %s4496_s10 }
  0x13   :  { %p4503_p8 = por %p4502_p7, %p4501_p6 }
  0x15   :  { %p4504_p9 = pnand %p4503_p8, %p4497_p5 }
  0x17   :  { %4507 = shalt.err (!%p4504_p9)
}
  0x18   :  { %s4558_s11 = smov 256   ;;  %s4559_s12 = smov 16  }
  0x19   :  { %32 = dma.hbm_to_vmem [thread:$0]  %s4709_s3, 49152, %s27_s9, [#allocation3], %s4558_s11, %s4558_s11, %s4559_s12  }
  0x1a   :  { %s4560_s15 = smov [#allocation6]  }
  0x1b   :  { %s50_s16 = sshll.u32 %s4560_s15, 4  ;;  %s51_s16 = int_to_ptr.vmem [resolvable:$true] %s50_s16 }
  0x1c   :  { %s4516_s4 = scalar_lea.vmem %s51_s16, 2048  ;;  %p4521_p11 = scmp.lt.s32.totalorder %s51_s16, %s51_s16 }
  0x1d   :  { %p4517_p10 = scmp.ne.s32.totalorder %s51_s16, %s4516_s4  ;;  %p4522_p12 = scmp.lt.s32.totalorder %s4516_s4, %s4516_s4 }
  0x1f   :  { %p4523_p13 = por %p4522_p12, %p4521_p11 }
  0x21   :  { %p4524_p0 = pnand %p4523_p13, %p4517_p10 }
  0x23   :  { %4527 = shalt.err (!%p4524_p0)
}
  0x24   :  { %s4561_s17 = smov 64   ;;  %s4562_s18 = smov 4  }
  0x25   :  { %56 = dma.hbm_to_vmem [thread:$0]  %s4711_s5, 2048, %s51_s16, [#allocation5], %s4561_s17, %s4561_s17, %s4562_s18  }
  0x26   :  { %s4563_s21 = smov [#allocation7]  }
  0x27   :  { %s63_s22 = sshll.u32 %s4563_s21, 4  ;;  %s64_s22 = int_to_ptr.vmem [resolvable:$true] %s63_s22 }
  0x28   :  { %s4536_s3 = scalar_lea.vmem %s64_s22, 128  ;;  %p4541_p2 = scmp.lt.s32.totalorder %s64_s22, %s64_s22 }
  0x29   :  { %p4537_p1 = scmp.ne.s32.totalorder %s64_s22, %s4536_s3  ;;  %p4542_p3 = scmp.lt.s32.totalorder %s4536_s3, %s4536_s3 }
  0x2b   :  { %p4543_p4 = por %p4542_p3, %p4541_p2 }
  0x2d   :  { %p4544_p5 = pnand %p4543_p4, %p4537_p1 }
  0x2f   :  { %4547 = shalt.err (!%p4544_p5)
}
  0x30   :  { %66 = dma.hbm_to_vmem [thread:$0]  %s4712_s6, 128, %s64_s22, [#allocation8]  }
  0x31   :  { %4548 = dma.done.wait [#allocation3], 49152  }
  0x32   :  { %4549 = vsyncadd [#allocation3], 4294918144 }
  0x33   :  { %4550 = dma.done.wait [#allocation5], 4096  }
  0x34   :  { %4551 = vsyncadd [#allocation5], 4294963200 }
  0x35   :  { %4552 = dma.done.wait [#allocation8], 128  }
  0x36   :  { %4553 = vsyncadd [#allocation8], 4294967168  ;;  %v4564_v0 = vmov 0   ;;  %v4565_v1 = vmov 0.0|0.0   ;;  %v3812_v2 = vld [vmem:[#allocation2 + $0xe4] ss:$16 sps:$4 sm:$0xff]  }
  0x37   :  { %738 = vmatprep.mubr.bf16.mxu1 %v4564_v0  ;;  %697 = vmatprep.mubr.bf16.mxu0 %v4565_v1  ;;  %v3814_v3 = vld [vmem:[#allocation2 + $0x2e4] ss:$16 sps:$4 sm:$0xff]   ;;  %v3816_v4 = vld [vmem:[#allocation2 + $0xe0] ss:$16 sps:$4 sm:$0xff]   ;;  %v3864_v36 = vld [vmem:[#allocation2 + $0xec] ss:$16 sps:$4 sm:$0xff]  }
  0x38   :  { %665 = vmatprep.subr.bf16.mxu0 %v3812_v2  ;;  %v3817_v5 = vld [vmem:[#allocation2 + $0x2e0] ss:$16 sps:$4 sm:$0xff]   ;;  %706 = vmatprep.subr.bf16.mxu1 %v3814_v3  ;;  %v3818_v6 = vld [vmem:[#allocation2 + $0xc4] ss:$16 sps:$4 sm:$0xff]   ;;  %v3862_v38 = vld [vmem:[#allocation2 + $0xe8] ss:$16 sps:$4 sm:$0xff]  }
  0x39   :  { %666 = vmatpush1.bf16.msra.mxu0 %v3816_v4  ;;  %707 = vmatpush1.bf16.msra.mxu1 %v3817_v5  ;;  %v3820_v7 = vld [vmem:[#allocation2 + $0x2c4] ss:$16 sps:$4 sm:$0xff]   ;;  %v3822_v8 = vld [vmem:[#allocation2 + $0xc0] ss:$16 sps:$4 sm:$0xff]   ;;  %v3870_v41 = vld [vmem:[#allocation2 + $0xcc] ss:$16 sps:$4 sm:$0xff]  }
  0x3a   :  { %667 = vmatprep.subr.bf16.mxu0 %v3818_v6  ;;  %v3823_v9 = vld [vmem:[#allocation2 + $0x2c0] ss:$16 sps:$4 sm:$0xff]   ;;  %708 = vmatprep.subr.bf16.mxu1 %v3820_v7  ;;  %v3824_v10 = vld [vmem:[#allocation2 + $0xa4] ss:$16 sps:$4 sm:$0xff]   ;;  %v3868_v42 = vld [vmem:[#allocation2 + $0xc8] ss:$16 sps:$4 sm:$0xff]  }
  0x3b   :  { %v3826_v11 = vld [vmem:[#allocation2 + $0x2a4] ss:$16 sps:$4 sm:$0xff]   ;;  %v3828_v12 = vld [vmem:[#allocation2 + $0xa0] ss:$16 sps:$4 sm:$0xff]   ;;  %v3876_v45 = vld [vmem:[#allocation2 + $0xac] ss:$16 sps:$4 sm:$0xff]  }
  0x3c   :  { %v3829_v13 = vld [vmem:[#allocation2 + $0x2a0] ss:$16 sps:$4 sm:$0xff]   ;;  %v3830_v14 = vld [vmem:[#allocation2 + $0x84] ss:$16 sps:$4 sm:$0xff]   ;;  %v3874_v46 = vld [vmem:[#allocation2 + $0xa8] ss:$16 sps:$4 sm:$0xff]  }
  0x3d   :  { %668 = vmatpush1.bf16.msra.mxu0 %v3822_v8  ;;  %709 = vmatpush1.bf16.msra.mxu1 %v3823_v9  ;;  %v3832_v15 = vld [vmem:[#allocation2 + $0x284] ss:$16 sps:$4 sm:$0xff]   ;;  %v3834_v16 = vld [vmem:[#allocation2 + $0x80] ss:$16 sps:$4 sm:$0xff]   ;;  %v3882_v49 = vld [vmem:[#allocation2 + $0x8c] ss:$16 sps:$4 sm:$0xff]  }
  0x3e   :  { %669 = vmatprep.subr.bf16.mxu0 %v3824_v10  ;;  %710 = vmatprep.subr.bf16.mxu1 %v3826_v11  ;;  %v3835_v17 = vld [vmem:[#allocation2 + $0x280] ss:$16 sps:$4 sm:$0xff]   ;;  %v3836_v18 = vld [vmem:[#allocation2 + $0x64] ss:$16 sps:$4 sm:$0xff]   ;;  %v3880_v50 = vld [vmem:[#allocation2 + $0x88] ss:$16 sps:$4 sm:$0xff]  }
  0x3f   :  { %v3838_v19 = vld [vmem:[#allocation2 + $0x264] ss:$16 sps:$4 sm:$0xff]   ;;  %v3840_v20 = vld [vmem:[#allocation2 + $0x60] ss:$16 sps:$4 sm:$0xff]   ;;  %v3888_v53 = vld [vmem:[#allocation2 + $0x6c] ss:$16 sps:$4 sm:$0xff]  }
  0x40   :  { %v3841_v21 = vld [vmem:[#allocation2 + $0x260] ss:$16 sps:$4 sm:$0xff]   ;;  %v3842_v22 = vld [vmem:[#allocation2 + $0x44] ss:$16 sps:$4 sm:$0xff]   ;;  %v3886_v54 = vld [vmem:[#allocation2 + $0x68] ss:$16 sps:$4 sm:$0xff]  }
  0x41   :  { %670 = vmatpush1.bf16.msra.mxu0 %v3828_v12  ;;  %711 = vmatpush1.bf16.msra.mxu1 %v3829_v13  ;;  %v3844_v23 = vld [vmem:[#allocation2 + $0x244] ss:$16 sps:$4 sm:$0xff]   ;;  %v3846_v24 = vld [vmem:[#allocation2 + $0x40] ss:$16 sps:$4 sm:$0xff]   ;;  %v3894_v57 = vld [vmem:[#allocation2 + $0x4c] ss:$16 sps:$4 sm:$0xff]  }
  0x42   :  { %671 = vmatprep.subr.bf16.mxu0 %v3830_v14  ;;  %712 = vmatprep.subr.bf16.mxu1 %v3832_v15  ;;  %v3847_v25 = vld [vmem:[#allocation2 + $0x240] ss:$16 sps:$4 sm:$0xff]   ;;  %v3848_v26 = vld [vmem:[#allocation2 + $0x24] ss:$16 sps:$4 sm:$0xff]   ;;  %v3892_v58 = vld [vmem:[#allocation2 + $0x48] ss:$16 sps:$4 sm:$0xff]  }
  0x43   :  { %v3850_v27 = vld [vmem:[#allocation2 + $0x224] ss:$16 sps:$4 sm:$0xff]   ;;  %v3852_v28 = vld [vmem:[#allocation2 + $0x20] ss:$16 sps:$4 sm:$0xff]   ;;  %v3900_v61 = vld [vmem:[#allocation2 + $0x2c] ss:$16 sps:$4 sm:$0xff]  }
  0x44   :  { %v3853_v29 = vld [vmem:[#allocation2 + $0x220] ss:$16 sps:$4 sm:$0xff]   ;;  %v3854_v30 = vld [vmem:[#allocation2 + $0x4] ss:$16 sps:$4 sm:$0xff]   ;;  %v3898_v62 = vld [vmem:[#allocation2 + $0x28] ss:$16 sps:$4 sm:$0xff]  }
  0x45   :  { %672 = vmatpush1.bf16.msra.mxu0 %v3834_v16  ;;  %713 = vmatpush1.bf16.msra.mxu1 %v3835_v17  ;;  %v3856_v31 = vld [vmem:[#allocation2 + $0x204] ss:$16 sps:$4 sm:$0xff]   ;;  %v3858_v32 = vld [vmem:[#allocation2] ss:$16 sps:$4 sm:$0xff]   ;;  %v3906_v3 = vld [vmem:[#allocation2 + $0xc] ss:$16 sps:$4 sm:$0xff]  }
  0x46   :  { %673 = vmatprep.subr.bf16.mxu0 %v3836_v18  ;;  %714 = vmatprep.subr.bf16.mxu1 %v3838_v19  ;;  %v3859_v33 = vld [vmem:[#allocation2 + $0x200] ss:$16 sps:$4 sm:$0xff]   ;;  %v3860_v35 = vld [vmem:[#allocation2 + $0x1e4] ss:$16 sps:$4 sm:$0xff]   ;;  %v3904_v4 = vld [vmem:[#allocation2 + $0x8] ss:$16 sps:$4 sm:$0xff]  }
  0x47   :  { %v81_v34 = vld [vmem:[%s4707_s1] sm:$0xff]  ;;  %v3910_v7 = vld [vmem:[#allocation2 + $0x1ec] ss:$16 sps:$4 sm:$0xff]   ;;  %v3908_v10 = vld [vmem:[#allocation2 + $0x1e8] ss:$16 sps:$4 sm:$0xff]  }
  0x48   :  { %v4623_v37 = vpack.c.bf16 %v81_v34, %v81_v34  ;;  %v3865_v39 = vld [vmem:[#allocation2 + $0x1e0] ss:$16 sps:$4 sm:$0xff]   ;;  %v3866_v40 = vld [vmem:[#allocation2 + $0x1c4] ss:$16 sps:$4 sm:$0xff]   ;;  %v3913_v8 = vld [vmem:[#allocation2 + $0x2ec] ss:$16 sps:$4 sm:$0xff]  }
  0x49   :  { %674 = vmatpush1.bf16.msra.mxu0 %v3840_v20  ;;  %715 = vmatpush1.bf16.msra.mxu1 %v3841_v21  ;;  %v3871_v43 = vld [vmem:[#allocation2 + $0x1c0] ss:$16 sps:$4 sm:$0xff]   ;;  %v3872_v44 = vld [vmem:[#allocation2 + $0x1a4] ss:$16 sps:$4 sm:$0xff]   ;;  %v3911_v11 = vld [vmem:[#allocation2 + $0x2e8] ss:$16 sps:$4 sm:$0xff]  }
  0x4a   :  { %675 = vmatprep.subr.bf16.mxu0 %v3842_v22  ;;  %716 = vmatprep.subr.bf16.mxu1 %v3844_v23  ;;  %v3877_v47 = vld [vmem:[#allocation2 + $0x1a0] ss:$16 sps:$4 sm:$0xff]   ;;  %v3878_v48 = vld [vmem:[#allocation2 + $0x184] ss:$16 sps:$4 sm:$0xff]   ;;  %v3916_v12 = vld [vmem:[#allocation2 + $0x1cc] ss:$16 sps:$4 sm:$0xff]  }
  0x4b   :  { %v3883_v51 = vld [vmem:[#allocation2 + $0x180] ss:$16 sps:$4 sm:$0xff]   ;;  %v3884_v52 = vld [vmem:[#allocation2 + $0x164] ss:$16 sps:$4 sm:$0xff]   ;;  %v3919_v13 = vld [vmem:[#allocation2 + $0x2cc] ss:$16 sps:$4 sm:$0xff]  }
  0x4c   :  { %v3889_v55 = vld [vmem:[#allocation2 + $0x160] ss:$16 sps:$4 sm:$0xff]   ;;  %v3890_v56 = vld [vmem:[#allocation2 + $0x144] ss:$16 sps:$4 sm:$0xff]   ;;  %v3914_v14 = vld [vmem:[#allocation2 + $0x1c8] ss:$16 sps:$4 sm:$0xff]  }
  0x4d   :  { %676 = vmatpush1.bf16.msra.mxu0 %v3846_v24  ;;  %717 = vmatpush1.bf16.msra.mxu1 %v3847_v25  ;;  %v3895_v59 = vld [vmem:[#allocation2 + $0x140] ss:$16 sps:$4 sm:$0xff]   ;;  %v3896_v60 = vld [vmem:[#allocation2 + $0x124] ss:$16 sps:$4 sm:$0xff]   ;;  %v3917_v15 = vld [vmem:[#allocation2 + $0x2c8] ss:$16 sps:$4 sm:$0xff]  }
  0x4e   :  { %677 = vmatprep.subr.bf16.mxu0 %v3848_v26  ;;  %718 = vmatprep.subr.bf16.mxu1 %v3850_v27  ;;  %v3901_v63 = vld [vmem:[#allocation2 + $0x120] ss:$16 sps:$4 sm:$0xff]   ;;  %v3902_v2 = vld [vmem:[#allocation2 + $0x104] ss:$16 sps:$4 sm:$0xff]   ;;  %v3922_v16 = vld [vmem:[#allocation2 + $0x1ac] ss:$16 sps:$4 sm:$0xff]  }
  0x4f   :  { %v3907_v5 = vld [vmem:[#allocation2 + $0x100] ss:$16 sps:$4 sm:$0xff]   ;;  %v3925_v17 = vld [vmem:[#allocation2 + $0x2ac] ss:$16 sps:$4 sm:$0xff]   ;;  %v3920_v18 = vld [vmem:[#allocation2 + $0x1a8] ss:$16 sps:$4 sm:$0xff]  }
  0x50   :  { %v80_v6 = vld [vmem:[%s4706_s0] sm:$0xff]  ;;  %v3923_v19 = vld [vmem:[#allocation2 + $0x2a8] ss:$16 sps:$4 sm:$0xff]   ;;  %v3928_v20 = vld [vmem:[#allocation2 + $0x18c] ss:$16 sps:$4 sm:$0xff]  }
  0x51   :  { %678 = vmatpush1.bf16.msra.mxu0 %v3852_v28  ;;  %719 = vmatpush1.bf16.msra.mxu1 %v3853_v29  ;;  %v4630_v9 = vpack.c.bf16 %v80_v6, %v80_v6  ;;  %v3931_v21 = vld [vmem:[#allocation2 + $0x28c] ss:$16 sps:$4 sm:$0xff]   ;;  %v3926_v22 = vld [vmem:[#allocation2 + $0x188] ss:$16 sps:$4 sm:$0xff]   ;;  %v4000_v6 = vld [vmem:[#allocation2 + $0x304] ss:$16 sps:$4 sm:$0xff]  }
  0x52   :  { %679 = vmatprep.subr.bf16.mxu0 %v3854_v30  ;;  %720 = vmatprep.subr.bf16.mxu1 %v3856_v31  ;;  %v3929_v23 = vld [vmem:[#allocation2 + $0x288] ss:$16 sps:$4 sm:$0xff]   ;;  %v3934_v24 = vld [vmem:[#allocation2 + $0x16c] ss:$16 sps:$4 sm:$0xff]  }
  0x53   :  { %v3937_v25 = vld [vmem:[#allocation2 + $0x26c] ss:$16 sps:$4 sm:$0xff]   ;;  %v3932_v26 = vld [vmem:[#allocation2 + $0x168] ss:$16 sps:$4 sm:$0xff]  }
  0x54   :  { %v3935_v27 = vld [vmem:[#allocation2 + $0x268] ss:$16 sps:$4 sm:$0xff]   ;;  %v3940_v28 = vld [vmem:[#allocation2 + $0x14c] ss:$16 sps:$4 sm:$0xff]  }
  0x55   :  { %680 = vmatpush1.bf16.msra.mxu0 %v3858_v32  ;;  %721 = vmatpush1.bf16.msra.mxu1 %v3859_v33  ;;  %v3943_v29 = vld [vmem:[#allocation2 + $0x24c] ss:$16 sps:$4 sm:$0xff]   ;;  %v3938_v30 = vld [vmem:[#allocation2 + $0x148] ss:$16 sps:$4 sm:$0xff]  }
  0x56   :  { %681 = vmatprep.subr.bf16.mxu0 %v3860_v35  ;;  %747 = vmatprep.subr.bf16.mxu1 %v3864_v36  ;;  %v3941_v31 = vld [vmem:[#allocation2 + $0x248] ss:$16 sps:$4 sm:$0xff]   ;;  %v3946_v32 = vld [vmem:[#allocation2 + $0x12c] ss:$16 sps:$4 sm:$0xff]  }
  0x57   :  { %v3949_v33 = vld [vmem:[#allocation2 + $0x22c] ss:$16 sps:$4 sm:$0xff]   ;;  %v3944_v34 = vld [vmem:[#allocation2 + $0x128] ss:$16 sps:$4 sm:$0xff]  }
  0x58   :  { %739 = vmatmul.mubr.bf16.vlgmr.msra.gmra.mxu1 %v4623_v37  ;;  %v3947_v35 = vld [vmem:[#allocation2 + $0x228] ss:$16 sps:$4 sm:$0xff]   ;;  %v3952_v36 = vld [vmem:[#allocation2 + $0x10c] ss:$16 sps:$4 sm:$0xff]  }
  0x59   :  { %682 = vmatpush2.bf16.msra.mxu0 %v3865_v39  ;;  %748 = vmatpush1.bf16.msra.mxu1 %v3862_v38  ;;  %v3955_v38 = vld [vmem:[#allocation2 + $0x20c] ss:$16 sps:$4 sm:$0xff]   ;;  %v3950_v39 = vld [vmem:[#allocation2 + $0x108] ss:$16 sps:$4 sm:$0xff]  }
  0x5a   :  { %683 = vmatprep.subr.bf16.mxu0 %v3866_v40  ;;  %749 = vmatprep.subr.bf16.mxu1 %v3870_v41  ;;  %v3953_v40 = vld [vmem:[#allocation2 + $0x208] ss:$16 sps:$4 sm:$0xff]   ;;  %v3958_v41 = vld [vmem:[#allocation2 + $0x3e4] ss:$16 sps:$4 sm:$0xff]  }
  0x5b   :  { %779 = vmatprep.mubr.bf16.mxu1 %v4565_v1 }
  0x5d   :  { %684 = vmatpush2.bf16.msra.mxu0 %v3871_v43  ;;  %750 = vmatpush1.bf16.msra.mxu1 %v3868_v42  ;;  %v3961_v42 = vld [vmem:[#allocation2 + $0x5e4] ss:$16 sps:$4 sm:$0xff]   ;;  %v3956_v43 = vld [vmem:[#allocation2 + $0x3e0] ss:$16 sps:$4 sm:$0xff]  }
  0x5e   :  { %685 = vmatprep.subr.bf16.mxu0 %v3872_v44  ;;  %751 = vmatprep.subr.bf16.mxu1 %v3876_v45  ;;  %v3959_v44 = vld [vmem:[#allocation2 + $0x5e0] ss:$16 sps:$4 sm:$0xff]   ;;  %v3964_v45 = vld [vmem:[#allocation2 + $0x3c4] ss:$16 sps:$4 sm:$0xff]  }
  0x61   :  { %686 = vmatpush2.bf16.msra.mxu0 %v3877_v47  ;;  %752 = vmatpush1.bf16.msra.mxu1 %v3874_v46  ;;  %v3967_v46 = vld [vmem:[#allocation2 + $0x5c4] ss:$16 sps:$4 sm:$0xff]   ;;  %v3962_v47 = vld [vmem:[#allocation2 + $0x3c0] ss:$16 sps:$4 sm:$0xff]  }
  0x62   :  { %687 = vmatprep.subr.bf16.mxu0 %v3878_v48  ;;  %753 = vmatprep.subr.bf16.mxu1 %v3882_v49  ;;  %v3965_v48 = vld [vmem:[#allocation2 + $0x5c0] ss:$16 sps:$4 sm:$0xff]   ;;  %v3970_v49 = vld [vmem:[#allocation2 + $0x3a4] ss:$16 sps:$4 sm:$0xff]  }
  0x65   :  { %688 = vmatpush2.bf16.msra.mxu0 %v3883_v51  ;;  %754 = vmatpush1.bf16.msra.mxu1 %v3880_v50  ;;  %v3973_v50 = vld [vmem:[#allocation2 + $0x5a4] ss:$16 sps:$4 sm:$0xff]   ;;  %v3968_v51 = vld [vmem:[#allocation2 + $0x3a0] ss:$16 sps:$4 sm:$0xff]  }
  0x66   :  { %689 = vmatprep.subr.bf16.mxu0 %v3884_v52  ;;  %755 = vmatprep.subr.bf16.mxu1 %v3888_v53  ;;  %v3971_v52 = vld [vmem:[#allocation2 + $0x5a0] ss:$16 sps:$4 sm:$0xff]   ;;  %v3976_v53 = vld [vmem:[#allocation2 + $0x384] ss:$16 sps:$4 sm:$0xff]  }
  0x69   :  { %690 = vmatpush2.bf16.msra.mxu0 %v3889_v55  ;;  %756 = vmatpush1.bf16.msra.mxu1 %v3886_v54  ;;  %v3974_v54 = vld [vmem:[#allocation2 + $0x380] ss:$16 sps:$4 sm:$0xff]  }
  0x6a   :  { %691 = vmatprep.subr.bf16.mxu0 %v3890_v56  ;;  %757 = vmatprep.subr.bf16.mxu1 %v3894_v57  ;;  %v3977_v55 = vld [vmem:[#allocation2 + $0x580] ss:$16 sps:$4 sm:$0xff]   ;;  %v3982_v56 = vld [vmem:[#allocation2 + $0x364] ss:$16 sps:$4 sm:$0xff]  }
  0x6b   :  { %v3985_v57 = vld [vmem:[#allocation2 + $0x564] ss:$16 sps:$4 sm:$0xff]  }
  0x6d   :  { %692 = vmatpush2.bf16.msra.mxu0 %v3895_v59  ;;  %758 = vmatpush1.bf16.msra.mxu1 %v3892_v58  ;;  %v3980_v58 = vld [vmem:[#allocation2 + $0x360] ss:$16 sps:$4 sm:$0xff]  }
  0x6e   :  { %693 = vmatprep.subr.bf16.mxu0 %v3896_v60  ;;  %759 = vmatprep.subr.bf16.mxu1 %v3900_v61  ;;  %v3983_v59 = vld [vmem:[#allocation2 + $0x560] ss:$16 sps:$4 sm:$0xff]   ;;  %v3988_v60 = vld [vmem:[#allocation2 + $0x344] ss:$16 sps:$4 sm:$0xff]  }
  0x6f   :  { %v3991_v61 = vld [vmem:[#allocation2 + $0x544] ss:$16 sps:$4 sm:$0xff]  }
  0x71   :  { %694 = vmatpush2.bf16.msra.mxu0 %v3901_v63  ;;  %760 = vmatpush1.bf16.msra.mxu1 %v3898_v62  ;;  %v3986_v62 = vld [vmem:[#allocation2 + $0x340] ss:$16 sps:$4 sm:$0xff]  }
  0x72   :  { %695 = vmatprep.subr.bf16.mxu0 %v3902_v2  ;;  %761 = vmatprep.subr.bf16.mxu1 %v3906_v3  ;;  %v3989_v63 = vld [vmem:[#allocation2 + $0x540] ss:$16 sps:$4 sm:$0xff]   ;;  %v3994_v2 = vld [vmem:[#allocation2 + $0x324] ss:$16 sps:$4 sm:$0xff]  }
  0x73   :  { %v3997_v3 = vld [vmem:[#allocation2 + $0x524] ss:$16 sps:$4 sm:$0xff]  }
  0x75   :  { %696 = vmatpush2.bf16.msra.mxu0 %v3907_v5  ;;  %762 = vmatpush1.bf16.msra.mxu1 %v3904_v4  ;;  %v3992_v4 = vld [vmem:[#allocation2 + $0x320] ss:$16 sps:$4 sm:$0xff]  }
  0x76   :  { %763 = vmatprep.subr.bf16.mxu1 %v3910_v7  ;;  %788 = vmatprep.subr.bf16.mxu0 %v3913_v8  ;;  %v3995_v5 = vld [vmem:[#allocation2 + $0x520] ss:$16 sps:$4 sm:$0xff]   ;;  %v4003_v7 = vld [vmem:[#allocation2 + $0x504] ss:$16 sps:$4 sm:$0xff]  }
  0x77   :  { %v3998_v8 = vld [vmem:[#allocation2 + $0x300] ss:$16 sps:$4 sm:$0xff]  }
  0x78   :  { %698 = vmatmul.mubr.bf16.vlgmr.msra.gmra.mxu0 %v4630_v9 }
  0x79   :  { %764 = vmatpush2.bf16.msra.mxu1 %v3908_v10  ;;  %789 = vmatpush1.bf16.msra.mxu0 %v3911_v11  ;;  %v4001_v10 = vld [vmem:[#allocation2 + $0x500] ss:$16 sps:$4 sm:$0xff]   ;;  %v4006_v11 = vld [vmem:[#allocation2 + $0x4e4] ss:$16 sps:$4 sm:$0xff]  }
  0x7a   :  { %765 = vmatprep.subr.bf16.mxu1 %v3916_v12  ;;  %790 = vmatprep.subr.bf16.mxu0 %v3919_v13  ;;  %v3459_v12 = vld [vmem:[%s4707_s1 + $0x8] sm:$0xff] }
  0x7b   :  { %820 = vmatprep.mubr.bf16.mxu0 %v4564_v0  ;;  %v4009_v13 = vld [vmem:[#allocation2 + $0x3ec] ss:$16 sps:$4 sm:$0xff]  }
  0x7d   :  { %766 = vmatpush2.bf16.msra.mxu1 %v3914_v14  ;;  %791 = vmatpush1.bf16.msra.mxu0 %v3917_v15  ;;  %v4004_v14 = vld [vmem:[#allocation2 + $0x4e0] ss:$16 sps:$4 sm:$0xff]   ;;  %v4641_v15 = vpack.c.bf16 %v3459_v12, %v3459_v12  ;;  %v4099_v12 = vld [vmem:[#allocation2 + $0x50c] ss:$16 sps:$4 sm:$0xff]  }
  0x7e   :  { %767 = vmatprep.subr.bf16.mxu1 %v3922_v16  ;;  %792 = vmatprep.subr.bf16.mxu0 %v3925_v17  ;;  %v4007_v16 = vld [vmem:[#allocation2 + $0x3e8] ss:$16 sps:$4 sm:$0xff]   ;;  %v4012_v17 = vld [vmem:[#allocation2 + $0x4c4] ss:$16 sps:$4 sm:$0xff]  }
  0x81   :  { %768 = vmatpush2.bf16.msra.mxu1 %v3920_v18  ;;  %793 = vmatpush1.bf16.msra.mxu0 %v3923_v19  ;;  %v4015_v18 = vld [vmem:[#allocation2 + $0x3cc] ss:$16 sps:$4 sm:$0xff]   ;;  %v4010_v19 = vld [vmem:[#allocation2 + $0x4c0] ss:$16 sps:$4 sm:$0xff]  }
  0x82   :  { %769 = vmatprep.subr.bf16.mxu1 %v3928_v20  ;;  %794 = vmatprep.subr.bf16.mxu0 %v3931_v21  ;;  %v4013_v20 = vld [vmem:[#allocation2 + $0x3c8] ss:$16 sps:$4 sm:$0xff]   ;;  %v4018_v21 = vld [vmem:[#allocation2 + $0x4a4] ss:$16 sps:$4 sm:$0xff]  }
  0x85   :  { %770 = vmatpush2.bf16.msra.mxu1 %v3926_v22  ;;  %795 = vmatpush1.bf16.msra.mxu0 %v3929_v23  ;;  %v4021_v22 = vld [vmem:[#allocation2 + $0x3ac] ss:$16 sps:$4 sm:$0xff]   ;;  %v4016_v23 = vld [vmem:[#allocation2 + $0x4a0] ss:$16 sps:$4 sm:$0xff]  }
  0x86   :  { %771 = vmatprep.subr.bf16.mxu1 %v3934_v24  ;;  %796 = vmatprep.subr.bf16.mxu0 %v3937_v25  ;;  %v4019_v24 = vld [vmem:[#allocation2 + $0x3a8] ss:$16 sps:$4 sm:$0xff]   ;;  %v4024_v25 = vld [vmem:[#allocation2 + $0x484] ss:$16 sps:$4 sm:$0xff]  }
  0x89   :  { %772 = vmatpush2.bf16.msra.mxu1 %v3932_v26  ;;  %797 = vmatpush1.bf16.msra.mxu0 %v3935_v27  ;;  %v4027_v26 = vld [vmem:[#allocation2 + $0x38c] ss:$16 sps:$4 sm:$0xff]   ;;  %v4022_v27 = vld [vmem:[#allocation2 + $0x480] ss:$16 sps:$4 sm:$0xff]  }
  0x8a   :  { %773 = vmatprep.subr.bf16.mxu1 %v3940_v28  ;;  %798 = vmatprep.subr.bf16.mxu0 %v3943_v29  ;;  %v4025_v28 = vld [vmem:[#allocation2 + $0x388] ss:$16 sps:$4 sm:$0xff]   ;;  %v4030_v29 = vld [vmem:[#allocation2 + $0x464] ss:$16 sps:$4 sm:$0xff]  }
  0x8d   :  { %774 = vmatpush2.bf16.msra.mxu1 %v3938_v30  ;;  %799 = vmatpush1.bf16.msra.mxu0 %v3941_v31  ;;  %v4033_v30 = vld [vmem:[#allocation2 + $0x36c] ss:$16 sps:$4 sm:$0xff]   ;;  %v4028_v31 = vld [vmem:[#allocation2 + $0x460] ss:$16 sps:$4 sm:$0xff]  }
  0x8e   :  { %775 = vmatprep.subr.bf16.mxu1 %v3946_v32  ;;  %800 = vmatprep.subr.bf16.mxu0 %v3949_v33  ;;  %v4031_v32 = vld [vmem:[#allocation2 + $0x368] ss:$16 sps:$4 sm:$0xff]   ;;  %v4036_v33 = vld [vmem:[#allocation2 + $0x444] ss:$16 sps:$4 sm:$0xff]  }
  0x91   :  { %776 = vmatpush2.bf16.msra.mxu1 %v3944_v34  ;;  %801 = vmatpush1.bf16.msra.mxu0 %v3947_v35  ;;  %v4039_v34 = vld [vmem:[#allocation2 + $0x34c] ss:$16 sps:$4 sm:$0xff]   ;;  %v4037_v35 = vld [vmem:[#allocation2 + $0x348] ss:$16 sps:$4 sm:$0xff]  }
  0x92   :  { %777 = vmatprep.subr.bf16.mxu1 %v3952_v36  ;;  %802 = vmatprep.subr.bf16.mxu0 %v3955_v38  ;;  %v4042_v36 = vld [vmem:[#allocation2 + $0x424] ss:$16 sps:$4 sm:$0xff]   ;;  %v4045_v38 = vld [vmem:[#allocation2 + $0x32c] ss:$16 sps:$4 sm:$0xff]  }
  0x95   :  { %778 = vmatpush2.bf16.msra.mxu1 %v3950_v39  ;;  %803 = vmatpush1.bf16.msra.mxu0 %v3953_v40  ;;  %v4040_v39 = vld [vmem:[#allocation2 + $0x420] ss:$16 sps:$4 sm:$0xff]   ;;  %v4043_v40 = vld [vmem:[#allocation2 + $0x328] ss:$16 sps:$4 sm:$0xff]  }
  0x96   :  { %1439 = vmatprep.subr.bf16.mxu0 %v3958_v41  ;;  %1480 = vmatprep.subr.bf16.mxu1 %v3961_v42  ;;  %v4048_v41 = vld [vmem:[#allocation2 + $0x404] ss:$16 sps:$4 sm:$0xff]   ;;  %v4051_v42 = vld [vmem:[#allocation2 + $0x30c] ss:$16 sps:$4 sm:$0xff]  }
  0x98   :  { %780 = vmatmul.mubr.bf16.vlgmr.msra.gmra.mxu1 %v4630_v9  ;;  %821 = vmatmul.mubr.bf16.vlgmr.msra.gmra.mxu0 %v4623_v37  ;;  %v3979_v37 = vld [vmem:[#allocation2 + $0x584] ss:$16 sps:$4 sm:$0xff]  }
  0x99   :  { %1440 = vmatpush1.bf16.msra.mxu0 %v3956_v43  ;;  %1481 = vmatpush1.bf16.msra.mxu1 %v3959_v44  ;;  %v4046_v43 = vld [vmem:[#allocation2 + $0x400] ss:$16 sps:$4 sm:$0xff]   ;;  %v4049_v44 = vld [vmem:[#allocation2 + $0x308] ss:$16 sps:$4 sm:$0xff]  }
  0x9a   :  { %1441 = vmatprep.subr.bf16.mxu0 %v3964_v45  ;;  %1482 = vmatprep.subr.bf16.mxu1 %v3967_v46  ;;  %v4054_v45 = vld [vmem:[#allocation2 + $0x4ec] ss:$16 sps:$4 sm:$0xff]  }
  0x9b   :  { %1512 = vmatprep.mubr.bf16.mxu1 %v4564_v0  ;;  %1471 = vmatprep.mubr.bf16.mxu0 %v4565_v1  ;;  %v4057_v46 = vld [vmem:[#allocation2 + $0x5ec] ss:$16 sps:$4 sm:$0xff]  }
  0x9d   :  { %1442 = vmatpush1.bf16.msra.mxu0 %v3962_v47  ;;  %1483 = vmatpush1.bf16.msra.mxu1 %v3965_v48  ;;  %v4052_v47 = vld [vmem:[#allocation2 + $0x4e8] ss:$16 sps:$4 sm:$0xff]  }
  0x9e   :  { %1443 = vmatprep.subr.bf16.mxu0 %v3970_v49  ;;  %1484 = vmatprep.subr.bf16.mxu1 %v3973_v50  ;;  %v4055_v48 = vld [vmem:[#allocation2 + $0x5e8] ss:$16 sps:$4 sm:$0xff]   ;;  %v4060_v49 = vld [vmem:[#allocation2 + $0x4cc] ss:$16 sps:$4 sm:$0xff]  }
  0x9f   :  { %v4063_v50 = vld [vmem:[#allocation2 + $0x5cc] ss:$16 sps:$4 sm:$0xff]  }
  0xa1   :  { %1444 = vmatpush1.bf16.msra.mxu0 %v3968_v51  ;;  %1485 = vmatpush1.bf16.msra.mxu1 %v3971_v52  ;;  %v4058_v51 = vld [vmem:[#allocation2 + $0x4c8] ss:$16 sps:$4 sm:$0xff]  }
  0xa2   :  { %1445 = vmatprep.subr.bf16.mxu0 %v3976_v53  ;;  %1486 = vmatprep.subr.bf16.mxu1 %v3979_v37  ;;  %v4061_v52 = vld [vmem:[#allocation2 + $0x5c8] ss:$16 sps:$4 sm:$0xff]   ;;  %v4066_v53 = vld [vmem:[#allocation2 + $0x4ac] ss:$16 sps:$4 sm:$0xff]  }
  0xa3   :  { %v4069_v37 = vld [vmem:[#allocation2 + $0x5ac] ss:$16 sps:$4 sm:$0xff]  }
  0xa5   :  { %1446 = vmatpush1.bf16.msra.mxu0 %v3974_v54  ;;  %1487 = vmatpush1.bf16.msra.mxu1 %v3977_v55  ;;  %v4064_v54 = vld [vmem:[#allocation2 + $0x4a8] ss:$16 sps:$4 sm:$0xff]  }
  0xa6   :  { %1447 = vmatprep.subr.bf16.mxu0 %v3982_v56  ;;  %1488 = vmatprep.subr.bf16.mxu1 %v3985_v57  ;;  %v4067_v55 = vld [vmem:[#allocation2 + $0x5a8] ss:$16 sps:$4 sm:$0xff]   ;;  %v4072_v56 = vld [vmem:[#allocation2 + $0x48c] ss:$16 sps:$4 sm:$0xff]  }
  0xa7   :  { %v4075_v57 = vld [vmem:[#allocation2 + $0x58c] ss:$16 sps:$4 sm:$0xff]  }
  0xa9   :  { %1448 = vmatpush1.bf16.msra.mxu0 %v3980_v58  ;;  %1489 = vmatpush1.bf16.msra.mxu1 %v3983_v59  ;;  %v4070_v58 = vld [vmem:[#allocation2 + $0x488] ss:$16 sps:$4 sm:$0xff]  }
  0xaa   :  { %1449 = vmatprep.subr.bf16.mxu0 %v3988_v60  ;;  %1490 = vmatprep.subr.bf16.mxu1 %v3991_v61  ;;  %v4073_v59 = vld [vmem:[#allocation2 + $0x588] ss:$16 sps:$4 sm:$0xff]   ;;  %v4078_v60 = vld [vmem:[#allocation2 + $0x46c] ss:$16 sps:$4 sm:$0xff]  }
  0xab   :  { %v4081_v61 = vld [vmem:[#allocation2 + $0x56c] ss:$16 sps:$4 sm:$0xff]  }
  0xad   :  { %1450 = vmatpush1.bf16.msra.mxu0 %v3986_v62  ;;  %1491 = vmatpush1.bf16.msra.mxu1 %v3989_v63  ;;  %v4076_v62 = vld [vmem:[#allocation2 + $0x468] ss:$16 sps:$4 sm:$0xff]  }
  0xae   :  { %1451 = vmatprep.subr.bf16.mxu0 %v3994_v2  ;;  %1492 = vmatprep.subr.bf16.mxu1 %v3997_v3  ;;  %v4079_v63 = vld [vmem:[#allocation2 + $0x568] ss:$16 sps:$4 sm:$0xff]   ;;  %v4084_v2 = vld [vmem:[#allocation2 + $0x44c] ss:$16 sps:$4 sm:$0xff]  }
  0xaf   :  { %v4087_v3 = vld [vmem:[#allocation2 + $0x54c] ss:$16 sps:$4 sm:$0xff]  }
  0xb1   :  { %1452 = vmatpush1.bf16.msra.mxu0 %v3992_v4  ;;  %1493 = vmatpush1.bf16.msra.mxu1 %v3995_v5  ;;  %v4082_v4 = vld [vmem:[#allocation2 + $0x448] ss:$16 sps:$4 sm:$0xff]  }
  0xb2   :  { %1453 = vmatprep.subr.bf16.mxu0 %v4000_v6  ;;  %1494 = vmatprep.subr.bf16.mxu1 %v4003_v7  ;;  %v4085_v5 = vld [vmem:[#allocation2 + $0x548] ss:$16 sps:$4 sm:$0xff]   ;;  %v4090_v6 = vld [vmem:[#allocation2 + $0x42c] ss:$16 sps:$4 sm:$0xff]  }
  0xb3   :  { %v4093_v7 = vld [vmem:[#allocation2 + $0x52c] ss:$16 sps:$4 sm:$0xff]  }
  0xb5   :  { %1454 = vmatpush1.bf16.msra.mxu0 %v3998_v8  ;;  %1495 = vmatpush1.bf16.msra.mxu1 %v4001_v10  ;;  %v4088_v8 = vld [vmem:[#allocation2 + $0x428] ss:$16 sps:$4 sm:$0xff]  }
  0xb6   :  { %1455 = vmatprep.subr.bf16.mxu0 %v4006_v11  ;;  %1521 = vmatprep.subr.bf16.mxu1 %v4009_v13  ;;  %v4091_v10 = vld [vmem:[#allocation2 + $0x528] ss:$16 sps:$4 sm:$0xff]   ;;  %v4096_v11 = vld [vmem:[#allocation2 + $0x40c] ss:$16 sps:$4 sm:$0xff]  }
  0xb7   :  { %v4094_v13 = vld [vmem:[#allocation2 + $0x408] ss:$16 sps:$4 sm:$0xff]  }
  0xb8   :  { %1513 = vmatmul.mubr.bf16.vlgmr.msra.gmra.mxu1 %v4641_v15 }
  0xb9   :  { %1456 = vmatpush2.bf16.msra.mxu0 %v4004_v14  ;;  %1522 = vmatpush1.bf16.msra.mxu1 %v4007_v16  ;;  %v4097_v14 = vld [vmem:[#allocation2 + $0x508] ss:$16 sps:$4 sm:$0xff]   ;;  %v4100_v16 = vld [vmem:[#allocation2 + $0x8e0] ss:$16 sps:$4 sm:$0xff]  }
  0xba   :  { %1457 = vmatprep.subr.bf16.mxu0 %v4012_v17  ;;  %1523 = vmatprep.subr.bf16.mxu1 %v4015_v18  ;;  %v4102_v17 = vld [vmem:[#allocation2 + $0x8e4] ss:$16 sps:$4 sm:$0xff]  }
  0xbb   :  { %1553 = vmatprep.mubr.bf16.mxu1 %v4565_v1  ;;  %v4034_v1 = vld [vmem:[#allocation2 + $0x440] ss:$16 sps:$4 sm:$0xff]   ;;  %v4105_v18 = vld [vmem:[#allocation2 + $0x8c4] ss:$16 sps:$4 sm:$0xff]  }
  0xbd   :  { %1458 = vmatpush2.bf16.msra.mxu0 %v4010_v19  ;;  %1524 = vmatpush1.bf16.msra.mxu1 %v4013_v20  ;;  %v4103_v19 = vld [vmem:[#allocation2 + $0x8c0] ss:$16 sps:$4 sm:$0xff]   ;;  %v4108_v20 = vld [vmem:[#allocation2 + $0x8a4] ss:$16 sps:$4 sm:$0xff]  }
  0xbe   :  { %1459 = vmatprep.subr.bf16.mxu0 %v4018_v21  ;;  %1525 = vmatprep.subr.bf16.mxu1 %v4021_v22  ;;  %v4106_v21 = vld [vmem:[#allocation2 + $0x8a0] ss:$16 sps:$4 sm:$0xff]   ;;  %v4111_v22 = vld [vmem:[#allocation2 + $0x884] ss:$16 sps:$4 sm:$0xff]  }
  0xc1   :  { %1460 = vmatpush2.bf16.msra.mxu0 %v4016_v23  ;;  %1526 = vmatpush1.bf16.msra.mxu1 %v4019_v24  ;;  %v4109_v23 = vld [vmem:[#allocation2 + $0x880] ss:$16 sps:$4 sm:$0xff]   ;;  %v4117_v24 = vld [vmem:[#allocation2 + $0x844] ss:$16 sps:$4 sm:$0xff]  }
  0xc2   :  { %1461 = vmatprep.subr.bf16.mxu0 %v4024_v25  ;;  %1527 = vmatprep.subr.bf16.mxu1 %v4027_v26  ;;  %v4115_v25 = vld [vmem:[#allocation2 + $0x840] ss:$16 sps:$4 sm:$0xff]  }
  0xc5   :  { %1462 = vmatpush2.bf16.msra.mxu0 %v4022_v27  ;;  %1528 = vmatpush1.bf16.msra.mxu1 %v4025_v28  ;;  %v4120_v27 = vld [vmem:[#allocation2 + $0x824] ss:$16 sps:$4 sm:$0xff]  }
  0xc6   :  { %1463 = vmatprep.subr.bf16.mxu0 %v4030_v29  ;;  %1529 = vmatprep.subr.bf16.mxu1 %v4033_v30  ;;  %v4118_v29 = vld [vmem:[#allocation2 + $0x820] ss:$16 sps:$4 sm:$0xff]  }
  0xc9   :  { %1464 = vmatpush2.bf16.msra.mxu0 %v4028_v31  ;;  %1530 = vmatpush1.bf16.msra.mxu1 %v4031_v32  ;;  %v4123_v31 = vld [vmem:[#allocation2 + $0x804] ss:$16 sps:$4 sm:$0xff]  }
  0xca   :  { %1465 = vmatprep.subr.bf16.mxu0 %v4036_v33  ;;  %1531 = vmatprep.subr.bf16.mxu1 %v4039_v34  ;;  %v4121_v33 = vld [vmem:[#allocation2 + $0x800] ss:$16 sps:$4 sm:$0xff]   ;;  %v4126_v34 = vld [vmem:[#allocation2 + $0x6e4] ss:$16 sps:$4 sm:$0xff]  }
  0xcd   :  { %1466 = vmatpush2.bf16.msra.mxu0 %v4034_v1  ;;  %1532 = vmatpush1.bf16.msra.mxu1 %v4037_v35  ;;  %v4129_v1 = vld [vmem:[#allocation2 + $0x6ec] ss:$16 sps:$4 sm:$0xff]   ;;  %v3560_v35 = vld [vmem:[%s4707_s1 + $0x10] sm:$0xff] }
  0xce   :  { %1467 = vmatprep.subr.bf16.mxu0 %v4042_v36  ;;  %1533 = vmatprep.subr.bf16.mxu1 %v4045_v38  ;;  %v4124_v36 = vld [vmem:[#allocation2 + $0x6e0] ss:$16 sps:$4 sm:$0xff]   ;;  %v4127_v38 = vld [vmem:[#allocation2 + $0x6e8] ss:$16 sps:$4 sm:$0xff]  }
  0xd1   :  { %1468 = vmatpush2.bf16.msra.mxu0 %v4040_v39  ;;  %1534 = vmatpush1.bf16.msra.mxu1 %v4043_v40  ;;  %v4657_v39 = vpack.c.bf16 %v3560_v35, %v3560_v35  ;;  %v4132_v40 = vld [vmem:[#allocation2 + $0x6c4] ss:$16 sps:$4 sm:$0xff]   ;;  %v4201_v35 = vld [vmem:[#allocation2 + $0x76c] ss:$16 sps:$4 sm:$0xff]  }
  0xd2   :  { %1469 = vmatprep.subr.bf16.mxu0 %v4048_v41  ;;  %1535 = vmatprep.subr.bf16.mxu1 %v4051_v42  ;;  %v4135_v41 = vld [vmem:[#allocation2 + $0x6cc] ss:$16 sps:$4 sm:$0xff]   ;;  %v4130_v42 = vld [vmem:[#allocation2 + $0x6c0] ss:$16 sps:$4 sm:$0xff]  }
  0xd5   :  { %1470 = vmatpush2.bf16.msra.mxu0 %v4046_v43  ;;  %1536 = vmatpush1.bf16.msra.mxu1 %v4049_v44  ;;  %v4133_v43 = vld [vmem:[#allocation2 + $0x6c8] ss:$16 sps:$4 sm:$0xff]   ;;  %v4138_v44 = vld [vmem:[#allocation2 + $0x6a4] ss:$16 sps:$4 sm:$0xff]  }
  0xd6   :  { %1537 = vmatprep.subr.bf16.mxu1 %v4054_v45  ;;  %1562 = vmatprep.subr.bf16.mxu0 %v4057_v46  ;;  %v4141_v45 = vld [vmem:[#allocation2 + $0x6ac] ss:$16 sps:$4 sm:$0xff]   ;;  %v4136_v46 = vld [vmem:[#allocation2 + $0x6a0] ss:$16 sps:$4 sm:$0xff]  }
  0xd8   :  { %1472 = vmatmul.mubr.bf16.vlgmr.msra.gmra.mxu0 %v4630_v9 }
  0xd9   :  { %1538 = vmatpush2.bf16.msra.mxu1 %v4052_v47  ;;  %1563 = vmatpush1.bf16.msra.mxu0 %v4055_v48  ;;  %v4139_v47 = vld [vmem:[#allocation2 + $0x6a8] ss:$16 sps:$4 sm:$0xff]   ;;  %v4144_v48 = vld [vmem:[#allocation2 + $0x684] ss:$16 sps:$4 sm:$0xff]  }
  0xda   :  { %1539 = vmatprep.subr.bf16.mxu1 %v4060_v49  ;;  %1564 = vmatprep.subr.bf16.mxu0 %v4063_v50  ;;  %v4147_v49 = vld [vmem:[#allocation2 + $0x68c] ss:$16 sps:$4 sm:$0xff]   ;;  %v4142_v50 = vld [vmem:[#allocation2 + $0x680] ss:$16 sps:$4 sm:$0xff]  }
  0xdb   :  { %1594 = vmatprep.mubr.bf16.mxu0 %v4564_v0 }
  0xdd   :  { %1540 = vmatpush2.bf16.msra.mxu1 %v4058_v51  ;;  %1565 = vmatpush1.bf16.msra.mxu0 %v4061_v52  ;;  %v4145_v51 = vld [vmem:[#allocation2 + $0x688] ss:$16 sps:$4 sm:$0xff]   ;;  %v4148_v52 = vld [vmem:[#allocation2 + $0x660] ss:$16 sps:$4 sm:$0xff]  }
  0xde   :  { %1541 = vmatprep.subr.bf16.mxu1 %v4066_v53  ;;  %1566 = vmatprep.subr.bf16.mxu0 %v4069_v37  ;;  %v4150_v53 = vld [vmem:[#allocation2 + $0x664] ss:$16 sps:$4 sm:$0xff]   ;;  %v4151_v37 = vld [vmem:[#allocation2 + $0x668] ss:$16 sps:$4 sm:$0xff]  }
  0xe1   :  { %1542 = vmatpush2.bf16.msra.mxu1 %v4064_v54  ;;  %1567 = vmatpush1.bf16.msra.mxu0 %v4067_v55  ;;  %v4153_v54 = vld [vmem:[#allocation2 + $0x66c] ss:$16 sps:$4 sm:$0xff]   ;;  %v4156_v55 = vld [vmem:[#allocation2 + $0x644] ss:$16 sps:$4 sm:$0xff]  }
  0xe2   :  { %1543 = vmatprep.subr.bf16.mxu1 %v4072_v56  ;;  %1568 = vmatprep.subr.bf16.mxu0 %v4075_v57  ;;  %v4159_v56 = vld [vmem:[#allocation2 + $0x64c] ss:$16 sps:$4 sm:$0xff]   ;;  %v4154_v57 = vld [vmem:[#allocation2 + $0x640] ss:$16 sps:$4 sm:$0xff]  }
  0xe5   :  { %1544 = vmatpush2.bf16.msra.mxu1 %v4070_v58  ;;  %1569 = vmatpush1.bf16.msra.mxu0 %v4073_v59  ;;  %v4157_v58 = vld [vmem:[#allocation2 + $0x648] ss:$16 sps:$4 sm:$0xff]   ;;  %v181_v59 = vld [vmem:[#allocation4] sm:$0xff] }
  0xe6   :  { %1545 = vmatprep.subr.bf16.mxu1 %v4078_v60  ;;  %1570 = vmatprep.subr.bf16.mxu0 %v4081_v61  ;;  %v182_v61 = vld [vmem:[#allocation4 + $0x8] sm:$0xff] }
  0xe9   :  { %1546 = vmatpush2.bf16.msra.mxu1 %v4076_v62  ;;  %1571 = vmatpush1.bf16.msra.mxu0 %v4079_v63  ;;  %v4162_v63 = vld [vmem:[#allocation2 + $0x624] ss:$16 sps:$4 sm:$0xff]  }
  0xea   :  { %1547 = vmatprep.subr.bf16.mxu1 %v4084_v2  ;;  %1572 = vmatprep.subr.bf16.mxu0 %v4087_v3  ;;  %v4165_v2 = vld [vmem:[#allocation2 + $0x62c] ss:$16 sps:$4 sm:$0xff]  }
  0xed   :  { %1548 = vmatpush2.bf16.msra.mxu1 %v4082_v4  ;;  %1573 = vmatpush1.bf16.msra.mxu0 %v4085_v5  ;;  %v4160_v4 = vld [vmem:[#allocation2 + $0x620] ss:$16 sps:$4 sm:$0xff]   ;;  %v4163_v5 = vld [vmem:[#allocation2 + $0x628] ss:$16 sps:$4 sm:$0xff]  }
  0xee   :  { %1549 = vmatprep.subr.bf16.mxu1 %v4090_v6  ;;  %1574 = vmatprep.subr.bf16.mxu0 %v4093_v7 }
  0xf1   :  { %1550 = vmatpush2.bf16.msra.mxu1 %v4088_v8  ;;  %1575 = vmatpush1.bf16.msra.mxu0 %v4091_v10 }
  0xf2   :  { %1551 = vmatprep.subr.bf16.mxu1 %v4096_v11  ;;  %1576 = vmatprep.subr.bf16.mxu0 %v4099_v12  ;;  %v4168_v11 = vld [vmem:[#allocation2 + $0x604] ss:$16 sps:$4 sm:$0xff]  }
  0xf5   :  { %1552 = vmatpush2.bf16.msra.mxu1 %v4094_v13  ;;  %1577 = vmatpush1.bf16.msra.mxu0 %v4097_v14  ;;  %v4166_v13 = vld [vmem:[#allocation2 + $0x600] ss:$16 sps:$4 sm:$0xff]   ;;  %v4169_v14 = vld [vmem:[#allocation2 + $0x608] ss:$16 sps:$4 sm:$0xff]  }
  0xf6   :  { %2257 = vmatprep.subr.bf16.mxu1 %v4102_v17  ;;  %2216 = vmatprep.subr.bf16.mxu0 %v4126_v34  ;;  %v4174_v17 = vld [vmem:[#allocation2 + $0x7e4] ss:$16 sps:$4 sm:$0xff]  }
  0xf7   :  { %v4198_v34 = vld [vmem:[#allocation2 + $0x764] ss:$16 sps:$4 sm:$0xff]  }
  0xf8   :  { %1554 = vmatmul.mubr.bf16.vlgmr.msra.gmra.mxu1 %v4630_v9  ;;  %1595 = vmatmul.mubr.bf16.vlgmr.msra.gmra.mxu0 %v4641_v15  ;;  %v4114_v9 = vld [vmem:[#allocation2 + $0x864] ss:$16 sps:$4 sm:$0xff]   ;;  %v4112_v15 = vld [vmem:[#allocation2 + $0x860] ss:$16 sps:$4 sm:$0xff]  }
  0xf9   :  { %2289 = vmatprep.mubr.bf16.mxu1 %v4564_v0  ;;  %2258 = vmatpush1.bf16.msra.mxu1 %v4100_v16  ;;  %v4171_v16 = vld [vmem:[#allocation2 + $0x60c] ss:$16 sps:$4 sm:$0xff]  }
  0xfa   :  { %2259 = vmatprep.subr.bf16.mxu1 %v4105_v18  ;;  %2217 = vmatpush1.bf16.msra.mxu0 %v4124_v36  ;;  %v4177_v18 = vld [vmem:[#allocation2 + $0x7ec] ss:$16 sps:$4 sm:$0xff]   ;;  %v4204_v36 = vld [vmem:[#allocation2 + $0x744] ss:$16 sps:$4 sm:$0xff]  }
  0xfb   :  { %2218 = vmatprep.subr.bf16.mxu0 %v4132_v40 }
  0xfd   :  { %2260 = vmatpush1.bf16.msra.mxu1 %v4103_v19  ;;  %v4172_v19 = vld [vmem:[#allocation2 + $0x7e0] ss:$16 sps:$4 sm:$0xff]  }
  0xfe   :  { %2261 = vmatprep.subr.bf16.mxu1 %v4108_v20  ;;  %2219 = vmatpush1.bf16.msra.mxu0 %v4130_v42  ;;  %v4175_v20 = vld [vmem:[#allocation2 + $0x7e8] ss:$16 sps:$4 sm:$0xff]  }
  0xff   :  { %2220 = vmatprep.subr.bf16.mxu0 %v4138_v44  ;;  %v4210_v44 = vld [vmem:[#allocation2 + $0x724] ss:$16 sps:$4 sm:$0xff]  }
 0x101   :  { %2262 = vmatpush1.bf16.msra.mxu1 %v4106_v21 }
 0x102   :  { %2263 = vmatprep.subr.bf16.mxu1 %v4111_v22  ;;  %2221 = vmatpush1.bf16.msra.mxu0 %v4136_v46  ;;  %v4213_v46 = vld [vmem:[#allocation2 + $0x72c] ss:$16 sps:$4 sm:$0xff]  }
 0x103   :  { %2222 = vmatprep.subr.bf16.mxu0 %v4144_v48 }
 0x105   :  { %2264 = vmatpush1.bf16.msra.mxu1 %v4109_v23  ;;  %v4180_v23 = vld [vmem:[#allocation2 + $0x7c4] ss:$16 sps:$4 sm:$0xff]  }
 0x106   :  { %2265 = vmatprep.subr.bf16.mxu1 %v4114_v9  ;;  %2223 = vmatpush1.bf16.msra.mxu0 %v4142_v50  ;;  %v4183_v9 = vld [vmem:[#allocation2 + $0x7cc] ss:$16 sps:$4 sm:$0xff]  }
 0x107   :  { %2224 = vmatprep.subr.bf16.mxu0 %v4150_v53 }
 0x109   :  { %2266 = vmatpush1.bf16.msra.mxu1 %v4112_v15  ;;  %v4178_v15 = vld [vmem:[#allocation2 + $0x7c0] ss:$16 sps:$4 sm:$0xff]  }
 0x10a   :  { %2267 = vmatprep.subr.bf16.mxu1 %v4117_v24  ;;  %2225 = vmatpush1.bf16.msra.mxu0 %v4148_v52  ;;  %v4181_v24 = vld [vmem:[#allocation2 + $0x7c8] ss:$16 sps:$4 sm:$0xff]   ;;  %v4208_v52 = vld [vmem:[#allocation2 + $0x720] ss:$16 sps:$4 sm:$0xff]  }
 0x10b   :  { %2226 = vmatprep.subr.bf16.mxu0 %v4156_v55 }
 0x10d   :  { %2268 = vmatpush1.bf16.msra.mxu1 %v4115_v25  ;;  %v4186_v25 = vld [vmem:[#allocation2 + $0x7a4] ss:$16 sps:$4 sm:$0xff]  }
 0x10e   :  { %2269 = vmatprep.subr.bf16.mxu1 %v4120_v27  ;;  %2227 = vmatpush1.bf16.msra.mxu0 %v4154_v57  ;;  %v4184_v27 = vld [vmem:[#allocation2 + $0x7a0] ss:$16 sps:$4 sm:$0xff]   ;;  %v4219_v57 = vld [vmem:[#allocation2 + $0x70c] ss:$16 sps:$4 sm:$0xff]  }
 0x10f   :  { %2228 = vmatprep.subr.bf16.mxu0 %v4162_v63 }
 0x111   :  { %2270 = vmatpush1.bf16.msra.mxu1 %v4118_v29  ;;  %v4192_v29 = vld [vmem:[#allocation2 + $0x784] ss:$16 sps:$4 sm:$0xff]  }
 0x112   :  { %2271 = vmatprep.subr.bf16.mxu1 %v4123_v31  ;;  %2229 = vmatpush1.bf16.msra.mxu0 %v4160_v4  ;;  %v4190_v31 = vld [vmem:[#allocation2 + $0x780] ss:$16 sps:$4 sm:$0xff]  }
 0x113   :  { %2230 = vmatprep.subr.bf16.mxu0 %v4168_v11 }
 0x115   :  { %2272 = vmatpush1.bf16.msra.mxu1 %v4121_v33  ;;  %v4196_v33 = vld [vmem:[#allocation2 + $0x760] ss:$16 sps:$4 sm:$0xff]  }
 0x116   :  { %2298 = vmatprep.subr.bf16.mxu1 %v4129_v1  ;;  %2231 = vmatpush1.bf16.msra.mxu0 %v4166_v13  ;;  %v4199_v1 = vld [vmem:[#allocation2 + $0x768] ss:$16 sps:$4 sm:$0xff]  }
 0x117   :  { %2232 = vmatprep.subr.bf16.mxu0 %v4174_v17 }
 0x118   :  { %v4650_v26 = vpop.f32.mrf.mxu1  ;;  %2290 = vmatmul.mubr.bf16.vlgmr.msra.gmra.mxu1 %v4657_v39 }
 0x119   :  { %2299 = vmatpush1.bf16.msra.mxu1 %v4127_v38  ;;  %v4207_v38 = vld [vmem:[#allocation2 + $0x74c] ss:$16 sps:$4 sm:$0xff]  }
 0x11a   :  { %v4652_v28 = vpop.f32.mrf.mxu1  ;;  %2300 = vmatprep.subr.bf16.mxu1 %v4135_v41  ;;  %2233 = vmatpush2.bf16.msra.mxu0 %v4172_v19  ;;  %v4202_v41 = vld [vmem:[#allocation2 + $0x740] ss:$16 sps:$4 sm:$0xff]  }
 0x11b   :  { %2234 = vmatprep.subr.bf16.mxu0 %v4180_v23 }
 0x11c   :  { %v744_v30 = vpop.f32.mrf.mxu1 }
 0x11d   :  { %2301 = vmatpush1.bf16.msra.mxu1 %v4133_v43  ;;  %v4195_v30 = vld [vmem:[#allocation2 + $0x78c] ss:$16 sps:$4 sm:$0xff]   ;;  %v4205_v43 = vld [vmem:[#allocation2 + $0x748] ss:$16 sps:$4 sm:$0xff]  }
 0x11e   :  { %v745_v32 = vpop.f32.mrf.mxu1  ;;  %2302 = vmatprep.subr.bf16.mxu1 %v4141_v45  ;;  %2235 = vmatpush2.bf16.msra.mxu0 %v4178_v15  ;;  %v183_v45 = vld [vmem:[#allocation4 + $0x10] sm:$0xff] }
 0x11f   :  { %2236 = vmatprep.subr.bf16.mxu0 %v4186_v25  ;;  %v4193_v32 = vld [vmem:[#allocation2 + $0x788] ss:$16 sps:$4 sm:$0xff]  }
 0x120   :  { %v956_v25 = vld [vmem:[#allocation4 + $0x28] sm:$0xff] }
 0x121   :  { %2303 = vmatpush1.bf16.msra.mxu1 %v4139_v47 }
 0x122   :  { %2304 = vmatprep.subr.bf16.mxu1 %v4147_v49  ;;  %2237 = vmatpush2.bf16.msra.mxu0 %v4184_v27 }
 0x123   :  { %2238 = vmatprep.subr.bf16.mxu0 %v4192_v29 }
 0x125   :  { %2305 = vmatpush1.bf16.msra.mxu1 %v4145_v51  ;;  %v184_v51 = vld [vmem:[#allocation4 + $0x18] sm:$0xff] }
 0x126   :  { %2306 = vmatprep.subr.bf16.mxu1 %v4153_v54  ;;  %2239 = vmatpush2.bf16.msra.mxu0 %v4190_v31  ;;  %v4216_v54 = vld [vmem:[#allocation2 + $0x704] ss:$16 sps:$4 sm:$0xff]  }
 0x127   :  { %2240 = vmatprep.subr.bf16.mxu0 %v4198_v34 }
 0x129   :  { %2307 = vmatpush1.bf16.msra.mxu1 %v4151_v37  ;;  %v4211_v37 = vld [vmem:[#allocation2 + $0x728] ss:$16 sps:$4 sm:$0xff]  }
 0x12a   :  { %2308 = vmatprep.subr.bf16.mxu1 %v4159_v56  ;;  %2241 = vmatpush2.bf16.msra.mxu0 %v4196_v33 }
 0x12b   :  { %2242 = vmatprep.subr.bf16.mxu0 %v4204_v36 }
 0x12d   :  { %2309 = vmatpush1.bf16.msra.mxu1 %v4157_v58 }
 0x12e   :  { %2310 = vmatprep.subr.bf16.mxu1 %v4165_v2  ;;  %2243 = vmatpush2.bf16.msra.mxu0 %v4202_v41  ;;  %v4217_v2 = vld [vmem:[#allocation2 + $0x708] ss:$16 sps:$4 sm:$0xff]  }
 0x12f   :  { %2244 = vmatprep.subr.bf16.mxu0 %v4210_v44  ;;  %v958_v44 = vld [vmem:[#allocation4 + $0x38] sm:$0xff] }
 0x131   :  { %2311 = vmatpush1.bf16.msra.mxu1 %v4163_v5 }
 0x132   :  { %2312 = vmatprep.subr.bf16.mxu1 %v4171_v16  ;;  %2245 = vmatpush2.bf16.msra.mxu0 %v4208_v52 }
 0x133   :  { %2246 = vmatprep.subr.bf16.mxu0 %v4216_v54 }
 0x135   :  { %2313 = vmatpush1.bf16.msra.mxu1 %v4169_v14 }
 0x136   :  { %2314 = vmatprep.subr.bf16.mxu1 %v4177_v18 }
 0x138   :  { %v699_v60 = vpop.f32.mrf.mxu0 }
 0x139   :  { %v700_v62 = vadd.f32 %v699_v60, %v181_v59  ;;  %2315 = vmatpush2.bf16.msra.mxu1 %v4175_v20 }
 0x13a   :  { %v701_v3 = vpop.f32.mrf.mxu0  ;;  %2316 = vmatprep.subr.bf16.mxu1 %v4183_v9 }
 0x13b   :  { %v741_v6 = vadd.f32 %v4650_v26, %v700_v62  ;;  %v702_v7 = vadd.f32 %v701_v3, %v182_v61  ;;  %v4189_v26 = vld [vmem:[#allocation2 + $0x7ac] ss:$16 sps:$4 sm:$0xff]   ;;  %v4214_v62 = vld [vmem:[#allocation2 + $0x700] ss:$16 sps:$4 sm:$0xff]  }
 0x13c   :  { %v703_v8 = vpop.f32.mrf.mxu0  ;;  %2247 = vmatpush2.bf16.msra.mxu0 %v4214_v62 }
 0x13d   :  { %v743_v10 = vadd.f32 %v4652_v28, %v702_v7  ;;  %v3456_v22 = vmul.f32 -1.442695, %v741_v6  ;;  %2317 = vmatpush2.bf16.msra.mxu1 %v4181_v24  ;;  %v4187_v28 = vld [vmem:[#allocation2 + $0x7a8] ss:$16 sps:$4 sm:$0xff]   ;;  %v4222_v6 = vld [vmem:[#allocation2 + $0x8ec] ss:$16 sps:$4 sm:$0xff]  }
 0x13e   :  { %v704_v12 = vpop.f32.mrf.mxu0  ;;  %2318 = vmatprep.subr.bf16.mxu1 %v4189_v26  ;;  %v4225_v7 = vld [vmem:[#allocation2 + $0xbe4] ss:$16 sps:$4 sm:$0xff]   ;;  %2339 = vmatprep.subr.bf16.mxu0 %v4222_v6  ;;  %v4220_v6 = vld [vmem:[#allocation2 + $0x8e8] ss:$16 sps:$4 sm:$0xff]  }
 0x13f   :  { %v3457_v21 = vmul.f32 -1.442695, %v743_v10  ;;  %v848_v10 = vld [vmem:[%s4708_s2] sm:$0xff] }
 0x140   :  { %v955_v26 = vld [vmem:[#allocation4 + $0x20] sm:$0xff] }
 0x141   :  { %4404 = vpow2.f32 %v3457_v21  ;;  %2319 = vmatpush2.bf16.msra.mxu1 %v4187_v28 }
 0x142   :  { %4406 = vpow2.f32 %v3456_v22  ;;  %2320 = vmatprep.subr.bf16.mxu1 %v4195_v30 }
 0x145   :  { %2321 = vmatpush2.bf16.msra.mxu1 %v4193_v32 }
 0x146   :  { %2322 = vmatprep.subr.bf16.mxu1 %v4201_v35 }
 0x149   :  { %2323 = vmatpush2.bf16.msra.mxu1 %v4199_v1 }
 0x14a   :  { %2324 = vmatprep.subr.bf16.mxu1 %v4207_v38  ;;  %v957_v38 = vld [vmem:[#allocation4 + $0x30] sm:$0xff] }
 0x14d   :  { %2325 = vmatpush2.bf16.msra.mxu1 %v4205_v43 }
 0x14e   :  { %v4405_v40 = vpop.eup %4404  ;;  %2326 = vmatprep.subr.bf16.mxu1 %v4213_v46 }
 0x14f   :  { %v4407_v42 = vpop.eup %4406  ;;  %v838_v47 = vadd.f32 1.0, %v4405_v40 }
 0x150   :  { %v832_v48 = vadd.f32 1.0, %v4407_v42 }
 0x151   :  { %4408 = vrcp.f32 %v838_v47  ;;  %2327 = vmatpush2.bf16.msra.mxu1 %v4211_v37 }
 0x152   :  { %4410 = vrcp.f32 %v832_v48  ;;  %2328 = vmatprep.subr.bf16.mxu1 %v4219_v57 }
 0x155   :  { %2329 = vmatpush2.bf16.msra.mxu1 %v4217_v2 }
 0x156   :  { %3032 = vmatprep.subr.bf16.mxu1 %v4225_v7  ;;  %v4223_v7 = vld [vmem:[#allocation2 + $0xbe0] ss:$16 sps:$4 sm:$0xff]  }
 0x158   :  { %v781_v49 = vpop.f32.mrf.mxu1  ;;  %v822_v50 = vpop.f32.mrf.mxu0 }
 0x159   :  { %v782_v53 = vadd.f32 %v781_v49, %v183_v45 }
 0x15a   :  { %v783_v55 = vpop.f32.mrf.mxu1  ;;  %v824_v56 = vpop.f32.mrf.mxu0 }
 0x15b   :  { %v823_v58 = vadd.f32 %v822_v50, %v782_v53  ;;  %v784_v59 = vadd.f32 %v783_v55, %v184_v51 }
 0x15c   :  { %v785_v60 = vpop.f32.mrf.mxu1  ;;  %v826_v61 = vpop.f32.mrf.mxu0 }
 0x15d   :  { %4412 = vtanh.f32 %v823_v58  ;;  %v825_v63 = vadd.f32 %v824_v56, %v784_v59  ;;  %v3559_v56 = vld [vmem:[%s4708_s2 + $0x8] sm:$0xff] }
 0x15e   :  { %v786_v3 = vpop.f32.mrf.mxu1  ;;  %v827_v4 = vpop.f32.mrf.mxu0 }
 0x15f   :  { %v3458_v5 = vmul.f32 -1.442695, %v825_v63  ;;  %v4409_v8 = vpop.eup %4408 }
 0x160   :  { %v4411_v11 = vpop.eup %4410  ;;  %v849_v13 = vmul.f32 %v4409_v8, %v848_v10  ;;  %v4228_v10 = vld [vmem:[#allocation2 + $0x8cc] ss:$16 sps:$4 sm:$0xff]  }
 0x161   :  { %4414 = vpow2.f32 %v3458_v5 }
 0x16a   :  { %v4413_v12 = vpop.eup %4412 }
 0x16b   :  { %v850_v14 = vmul.f32 %v4413_v12, %v4411_v11  ;;  %v4231_v11 = vld [vmem:[#allocation2 + $0xbc4] ss:$16 sps:$4 sm:$0xff]  }
 0x16d   :  { %v851_v16 = vadd.f32 %v850_v14, %v849_v13  ;;  %v4226_v13 = vld [vmem:[#allocation2 + $0x8c8] ss:$16 sps:$4 sm:$0xff]   ;;  %v4229_v14 = vld [vmem:[#allocation2 + $0xbc0] ss:$16 sps:$4 sm:$0xff]  }
 0x16e   :  { %v4415_v17 = vpop.eup %4414 }
 0x16f   :  { %v845_v18 = vadd.f32 1.0, %v4415_v17  ;;  %4416 = vtanh.f32 %v851_v16  ;;  %v4234_v16 = vld [vmem:[#allocation2 + $0x8ac] ss:$16 sps:$4 sm:$0xff]   ;;  %v4237_v17 = vld [vmem:[#allocation2 + $0xba4] ss:$16 sps:$4 sm:$0xff]  }
 0x171   :  { %4418 = vrcp.f32 %v845_v18 }
 0x178   :  { %v1514_v19 = vpop.f32.mrf.mxu1 }
 0x17a   :  { %v1516_v20 = vpop.f32.mrf.mxu1 }
 0x17c   :  { %v1518_v21 = vpop.f32.mrf.mxu1  ;;  %v4417_v22 = vpop.eup %4416 }
 0x17d   :  { %v4235_v21 = vld [vmem:[#allocation2 + $0xba0] ss:$16 sps:$4 sm:$0xff]  }
 0x17e   :  { %v4419_v23 = vpop.eup %4418  ;;  %v1519_v9 = vpop.f32.mrf.mxu1 }
 0x17f   :  { %v853_v15 = vmul.f32 %v4419_v23, %v4417_v22  ;;  %v4240_v22 = vld [vmem:[#allocation2 + $0x88c] ss:$16 sps:$4 sm:$0xff]   ;;  %v4243_v23 = vld [vmem:[#allocation2 + $0xb84] ss:$16 sps:$4 sm:$0xff]  }
 0x181   :  { %v4670_v8 = vpack.c.bf16 %v853_v15, %v853_v15  ;;  %v4238_v15 = vld [vmem:[#allocation2 + $0x888] ss:$16 sps:$4 sm:$0xff]  }
 0x198   :  { %v1473_v24 = vpop.f32.mrf.mxu0 }
 0x199   :  { %v1474_v29 = vadd.f32 %v1473_v24, %v955_v26  ;;  %v4241_v24 = vld [vmem:[#allocation2 + $0xb80] ss:$16 sps:$4 sm:$0xff]   ;;  %v4249_v26 = vld [vmem:[#allocation2 + $0xb64] ss:$16 sps:$4 sm:$0xff]  }
 0x19a   :  { %v1475_v27 = vpop.f32.mrf.mxu0 }
 0x19b   :  { %v1476_v28 = vadd.f32 %v1475_v27, %v956_v25  ;;  %v1515_v33 = vadd.f32 %v1514_v19, %v1474_v29  ;;  %v4246_v25 = vld [vmem:[#allocation2 + $0x86c] ss:$16 sps:$4 sm:$0xff]   ;;  %v4244_v27 = vld [vmem:[#allocation2 + $0x868] ss:$16 sps:$4 sm:$0xff]  }
 0x19c   :  { %v1477_v30 = vpop.f32.mrf.mxu0  ;;  %v4252_v29 = vld [vmem:[#allocation2 + $0x84c] ss:$16 sps:$4 sm:$0xff]  }
 0x19d   :  { %v1517_v32 = vadd.f32 %v1516_v20, %v1476_v28  ;;  %v3556_v1 = vmul.f32 -1.442695, %v1515_v33  ;;  %v4232_v20 = vld [vmem:[#allocation2 + $0x8a8] ss:$16 sps:$4 sm:$0xff]   ;;  %v4247_v28 = vld [vmem:[#allocation2 + $0xb60] ss:$16 sps:$4 sm:$0xff]  }
 0x19e   :  { %v1478_v31 = vpop.f32.mrf.mxu0  ;;  %v4255_v30 = vld [vmem:[#allocation2 + $0xb44] ss:$16 sps:$4 sm:$0xff]   ;;  %v4258_v33 = vld [vmem:[#allocation2 + $0x82c] ss:$16 sps:$4 sm:$0xff]  }
 0x19f   :  { %v3557_v34 = vmul.f32 -1.442695, %v1517_v32  ;;  %v4250_v31 = vld [vmem:[#allocation2 + $0x848] ss:$16 sps:$4 sm:$0xff]   ;;  %v4253_v32 = vld [vmem:[#allocation2 + $0xb40] ss:$16 sps:$4 sm:$0xff]  }
 0x1a1   :  { %4420 = vpow2.f32 %v3557_v34  ;;  %v4261_v34 = vld [vmem:[#allocation2 + $0xb24] ss:$16 sps:$4 sm:$0xff]  }
 0x1a2   :  { %4422 = vpow2.f32 %v3556_v1  ;;  %v4256_v1 = vld [vmem:[#allocation2 + $0x828] ss:$16 sps:$4 sm:$0xff]  }
 0x1ae   :  { %v4421_v35 = vpop.eup %4420 }
 0x1af   :  { %v4423_v36 = vpop.eup %4422  ;;  %v1612_v40 = vadd.f32 1.0, %v4421_v35  ;;  %v4259_v35 = vld [vmem:[#allocation2 + $0xb20] ss:$16 sps:$4 sm:$0xff]  }
 0x1b0   :  { %v1606_v41 = vadd.f32 1.0, %v4423_v36  ;;  %v4264_v36 = vld [vmem:[#allocation2 + $0x80c] ss:$16 sps:$4 sm:$0xff]  }
 0x1b1   :  { %4424 = vrcp.f32 %v1612_v40  ;;  %v4262_v40 = vld [vmem:[#allocation2 + $0x808] ss:$16 sps:$4 sm:$0xff]  }
 0x1b2   :  { %4426 = vrcp.f32 %v1606_v41  ;;  %v4265_v41 = vld [vmem:[#allocation2 + $0xb00] ss:$16 sps:$4 sm:$0xff]  }
 0x1b8   :  { %v1555_v42 = vpop.f32.mrf.mxu1  ;;  %v1596_v43 = vpop.f32.mrf.mxu0 }
 0x1b9   :  { %v1556_v45 = vadd.f32 %v1555_v42, %v957_v38  ;;  %v4267_v38 = vld [vmem:[#allocation2 + $0xb04] ss:$16 sps:$4 sm:$0xff]   ;;  %v3661_v42 = vld [vmem:[%s4707_s1 + $0x18] sm:$0xff] }
 0x1ba   :  { %v1557_v46 = vpop.f32.mrf.mxu1  ;;  %v1598_v47 = vpop.f32.mrf.mxu0 }
 0x1bb   :  { %v1597_v48 = vadd.f32 %v1596_v43, %v1556_v45  ;;  %v1558_v49 = vadd.f32 %v1557_v46, %v958_v44  ;;  %v4270_v43 = vld [vmem:[#allocation2 + $0x9e4] ss:$16 sps:$4 sm:$0xff]   ;;  %v4273_v44 = vld [vmem:[#allocation2 + $0x9ec] ss:$16 sps:$4 sm:$0xff]   ;;  %v4685_v45 = vpack.c.bf16 %v3661_v42, %v3661_v42  ;;  %v4268_v46 = vld [vmem:[#allocation2 + $0x9e0] ss:$16 sps:$4 sm:$0xff]  }
 0x1bc   :  { %v1559_v50 = vpop.f32.mrf.mxu1  ;;  %v1600_v51 = vpop.f32.mrf.mxu0  ;;  %v4352_v42 = vld [vmem:[#allocation2 + $0xa20] ss:$16 sps:$4 sm:$0xff]  }
 0x1bd   :  { %4428 = vtanh.f32 %v1597_v48  ;;  %v1599_v52 = vadd.f32 %v1598_v47, %v1558_v49  ;;  %v4271_v47 = vld [vmem:[#allocation2 + $0x9e8] ss:$16 sps:$4 sm:$0xff]   ;;  %v4276_v48 = vld [vmem:[#allocation2 + $0x9c4] ss:$16 sps:$4 sm:$0xff]   ;;  %v4279_v49 = vld [vmem:[#allocation2 + $0x9cc] ss:$16 sps:$4 sm:$0xff]  }
 0x1be   :  { %v1560_v53 = vpop.f32.mrf.mxu1  ;;  %v1601_v37 = vpop.f32.mrf.mxu0  ;;  %v4274_v50 = vld [vmem:[#allocation2 + $0x9c0] ss:$16 sps:$4 sm:$0xff]   ;;  %v4277_v51 = vld [vmem:[#allocation2 + $0x9c8] ss:$16 sps:$4 sm:$0xff]  }
 0x1bf   :  { %v3558_v54 = vmul.f32 -1.442695, %v1599_v52  ;;  %v4425_v55 = vpop.eup %4424  ;;  %v4282_v52 = vld [vmem:[#allocation2 + $0x9a4] ss:$16 sps:$4 sm:$0xff]   ;;  %v4285_v53 = vld [vmem:[#allocation2 + $0x9ac] ss:$16 sps:$4 sm:$0xff]  }
 0x1c0   :  { %v4427_v57 = vpop.eup %4426  ;;  %v1624_v59 = vmul.f32 %v4425_v55, %v3559_v56  ;;  %v4280_v37 = vld [vmem:[#allocation2 + $0x9a0] ss:$16 sps:$4 sm:$0xff]   ;;  %v4291_v55 = vld [vmem:[#allocation2 + $0x98c] ss:$16 sps:$4 sm:$0xff]  }
 0x1c1   :  { %4430 = vpow2.f32 %v3558_v54  ;;  %v4283_v54 = vld [vmem:[#allocation2 + $0x9a8] ss:$16 sps:$4 sm:$0xff]   ;;  %v4286_v56 = vld [vmem:[#allocation2 + $0x980] ss:$16 sps:$4 sm:$0xff]  }
 0x1ca   :  { %v4429_v58 = vpop.eup %4428 }
 0x1cb   :  { %v1625_v60 = vmul.f32 %v4429_v58, %v4427_v57  ;;  %v4289_v57 = vld [vmem:[#allocation2 + $0x988] ss:$16 sps:$4 sm:$0xff]   ;;  %v4294_v58 = vld [vmem:[#allocation2 + $0x964] ss:$16 sps:$4 sm:$0xff]  }
 0x1cd   :  { %v1626_v61 = vadd.f32 %v1625_v60, %v1624_v59  ;;  %v4297_v59 = vld [vmem:[#allocation2 + $0x96c] ss:$16 sps:$4 sm:$0xff]   ;;  %v4292_v60 = vld [vmem:[#allocation2 + $0x960] ss:$16 sps:$4 sm:$0xff]  }
 0x1ce   :  { %v4431_v62 = vpop.eup %4430 }
 0x1cf   :  { %v1619_v63 = vadd.f32 1.0, %v4431_v62  ;;  %4432 = vtanh.f32 %v1626_v61  ;;  %v4295_v61 = vld [vmem:[#allocation2 + $0x968] ss:$16 sps:$4 sm:$0xff]   ;;  %v4300_v62 = vld [vmem:[#allocation2 + $0x944] ss:$16 sps:$4 sm:$0xff]  }
 0x1d1   :  { %4434 = vrcp.f32 %v1619_v63  ;;  %v4303_v63 = vld [vmem:[#allocation2 + $0x94c] ss:$16 sps:$4 sm:$0xff]  }
 0x1d8   :  { %v4676_v12 = vpop.f32.mrf.mxu1 }
 0x1da   :  { %v4678_v18 = vpop.f32.mrf.mxu1 }
 0x1dc   :  { %v4433_v2 = vpop.eup %4432  ;;  %v2295_v19 = vpop.f32.mrf.mxu1 }
 0x1dd   :  { %v4316_v19 = vld [vmem:[#allocation2 + $0xae0] ss:$16 sps:$4 sm:$0xff]  }
 0x1de   :  { %v4435_v3 = vpop.eup %4434  ;;  %v2296_v9 = vpop.f32.mrf.mxu1 }
 0x1df   :  { %v1628_v4 = vmul.f32 %v4435_v3, %v4433_v2  ;;  %v4298_v2 = vld [vmem:[#allocation2 + $0x940] ss:$16 sps:$4 sm:$0xff]   ;;  %v4301_v3 = vld [vmem:[#allocation2 + $0x948] ss:$16 sps:$4 sm:$0xff]  }
 0x1e0   :  { %v4325_v9 = vld [vmem:[#allocation2 + $0xac8] ss:$16 sps:$4 sm:$0xff]  }
 0x1e1   :  { %v4668_v5 = vpack.c.bf16 %v1628_v4, %v1628_v4  ;;  %v4306_v4 = vld [vmem:[#allocation2 + $0x924] ss:$16 sps:$4 sm:$0xff]  }
 0x1e3   :  { %2248 = vmatprep.mubr.bf16.mxu0 %v4668_v5  ;;  %2330 = vmatprep.mubr.bf16.mxu1 %v4668_v5 }
 0x1e4   :  { %2249 = vmatmul.mubr.bf16.vlgmr.msra.gmra.mxu0 %v4670_v8  ;;  %2331 = vmatmul.mubr.bf16.vlgmr.msra.gmra.mxu1 %v4670_v8 }
 0x1e5   :  { %2340 = vmatpush1.bf16.msra.mxu0 %v4220_v6  ;;  %3033 = vmatpush1.bf16.msra.mxu1 %v4223_v7  ;;  %v4304_v6 = vld [vmem:[#allocation2 + $0x920] ss:$16 sps:$4 sm:$0xff]   ;;  %v4307_v7 = vld [vmem:[#allocation2 + $0x928] ss:$16 sps:$4 sm:$0xff]  }
 0x1e6   :  { %2341 = vmatprep.subr.bf16.mxu0 %v4228_v10  ;;  %3034 = vmatprep.subr.bf16.mxu1 %v4231_v11  ;;  %v4312_v10 = vld [vmem:[#allocation2 + $0x904] ss:$16 sps:$4 sm:$0xff]   ;;  %v4315_v11 = vld [vmem:[#allocation2 + $0x90c] ss:$16 sps:$4 sm:$0xff]  }
 0x1e7   :  { %2371 = vmatprep.mubr.bf16.mxu0 %v4564_v0  ;;  %3064 = vmatprep.mubr.bf16.mxu1 %v4564_v0 }
 0x1e9   :  { %2342 = vmatpush1.bf16.msra.mxu0 %v4226_v13  ;;  %3035 = vmatpush1.bf16.msra.mxu1 %v4229_v14  ;;  %v4310_v13 = vld [vmem:[#allocation2 + $0x900] ss:$16 sps:$4 sm:$0xff]   ;;  %v4313_v14 = vld [vmem:[#allocation2 + $0x908] ss:$16 sps:$4 sm:$0xff]  }
 0x1ea   :  { %2343 = vmatprep.subr.bf16.mxu0 %v4234_v16  ;;  %3036 = vmatprep.subr.bf16.mxu1 %v4237_v17  ;;  %v4318_v16 = vld [vmem:[#allocation2 + $0xae4] ss:$16 sps:$4 sm:$0xff]   ;;  %v4321_v17 = vld [vmem:[#allocation2 + $0xaec] ss:$16 sps:$4 sm:$0xff]  }
 0x1ed   :  { %2344 = vmatpush1.bf16.msra.mxu0 %v4232_v20  ;;  %3037 = vmatpush1.bf16.msra.mxu1 %v4235_v21  ;;  %v4319_v20 = vld [vmem:[#allocation2 + $0xae8] ss:$16 sps:$4 sm:$0xff]   ;;  %v4324_v21 = vld [vmem:[#allocation2 + $0xac4] ss:$16 sps:$4 sm:$0xff]  }
 0x1ee   :  { %2345 = vmatprep.subr.bf16.mxu0 %v4240_v22  ;;  %3038 = vmatprep.subr.bf16.mxu1 %v4243_v23  ;;  %v4327_v22 = vld [vmem:[#allocation2 + $0xacc] ss:$16 sps:$4 sm:$0xff]   ;;  %v4322_v23 = vld [vmem:[#allocation2 + $0xac0] ss:$16 sps:$4 sm:$0xff]  }
 0x1f1   :  { %2346 = vmatpush1.bf16.msra.mxu0 %v4238_v15  ;;  %3039 = vmatpush1.bf16.msra.mxu1 %v4241_v24  ;;  %v4330_v15 = vld [vmem:[#allocation2 + $0xaa4] ss:$16 sps:$4 sm:$0xff]   ;;  %v4333_v24 = vld [vmem:[#allocation2 + $0xaac] ss:$16 sps:$4 sm:$0xff]  }
 0x1f2   :  { %2347 = vmatprep.subr.bf16.mxu0 %v4246_v25  ;;  %3040 = vmatprep.subr.bf16.mxu1 %v4249_v26  ;;  %v4328_v25 = vld [vmem:[#allocation2 + $0xaa0] ss:$16 sps:$4 sm:$0xff]   ;;  %v4331_v26 = vld [vmem:[#allocation2 + $0xaa8] ss:$16 sps:$4 sm:$0xff]  }
 0x1f5   :  { %2348 = vmatpush1.bf16.msra.mxu0 %v4244_v27  ;;  %3041 = vmatpush1.bf16.msra.mxu1 %v4247_v28  ;;  %v4336_v27 = vld [vmem:[#allocation2 + $0xa84] ss:$16 sps:$4 sm:$0xff]   ;;  %v4339_v28 = vld [vmem:[#allocation2 + $0xa8c] ss:$16 sps:$4 sm:$0xff]  }
 0x1f6   :  { %2349 = vmatprep.subr.bf16.mxu0 %v4252_v29  ;;  %3042 = vmatprep.subr.bf16.mxu1 %v4255_v30  ;;  %v4334_v29 = vld [vmem:[#allocation2 + $0xa80] ss:$16 sps:$4 sm:$0xff]   ;;  %v4337_v30 = vld [vmem:[#allocation2 + $0xa88] ss:$16 sps:$4 sm:$0xff]  }
 0x1f9   :  { %2350 = vmatpush1.bf16.msra.mxu0 %v4250_v31  ;;  %3043 = vmatpush1.bf16.msra.mxu1 %v4253_v32  ;;  %v4342_v31 = vld [vmem:[#allocation2 + $0xa64] ss:$16 sps:$4 sm:$0xff]   ;;  %v4345_v32 = vld [vmem:[#allocation2 + $0xa6c] ss:$16 sps:$4 sm:$0xff]  }
 0x1fa   :  { %2351 = vmatprep.subr.bf16.mxu0 %v4258_v33  ;;  %3044 = vmatprep.subr.bf16.mxu1 %v4261_v34  ;;  %v4340_v33 = vld [vmem:[#allocation2 + $0xa60] ss:$16 sps:$4 sm:$0xff]   ;;  %v4343_v34 = vld [vmem:[#allocation2 + $0xa68] ss:$16 sps:$4 sm:$0xff]  }
 0x1fd   :  { %2352 = vmatpush1.bf16.msra.mxu0 %v4256_v1  ;;  %3045 = vmatpush1.bf16.msra.mxu1 %v4259_v35  ;;  %v4348_v1 = vld [vmem:[#allocation2 + $0xa44] ss:$16 sps:$4 sm:$0xff]   ;;  %v4351_v35 = vld [vmem:[#allocation2 + $0xa4c] ss:$16 sps:$4 sm:$0xff]  }
 0x1fe   :  { %2353 = vmatprep.subr.bf16.mxu0 %v4264_v36  ;;  %3046 = vmatprep.subr.bf16.mxu1 %v4267_v38  ;;  %v4346_v36 = vld [vmem:[#allocation2 + $0xa40] ss:$16 sps:$4 sm:$0xff]   ;;  %v4349_v38 = vld [vmem:[#allocation2 + $0xa48] ss:$16 sps:$4 sm:$0xff]  }
 0x201   :  { %2354 = vmatpush1.bf16.msra.mxu0 %v4262_v40  ;;  %3047 = vmatpush1.bf16.msra.mxu1 %v4265_v41  ;;  %v4354_v40 = vld [vmem:[#allocation2 + $0xa24] ss:$16 sps:$4 sm:$0xff]   ;;  %v4357_v41 = vld [vmem:[#allocation2 + $0xa2c] ss:$16 sps:$4 sm:$0xff]  }
 0x202   :  { %2991 = vmatprep.subr.bf16.mxu0 %v4270_v43  ;;  %3073 = vmatprep.subr.bf16.mxu1 %v4273_v44  ;;  %v4355_v43 = vld [vmem:[#allocation2 + $0xa28] ss:$16 sps:$4 sm:$0xff]   ;;  %v4360_v44 = vld [vmem:[#allocation2 + $0xa04] ss:$16 sps:$4 sm:$0xff]  }
 0x204   :  { %2372 = vmatmul.mubr.bf16.vlgmr.msra.gmra.mxu0 %v4657_v39  ;;  %3065 = vmatmul.mubr.bf16.vlgmr.msra.gmra.mxu1 %v4685_v45  ;;  %v4288_v39 = vld [vmem:[#allocation2 + $0x984] ss:$16 sps:$4 sm:$0xff]  }
 0x205   :  { %2992 = vmatpush1.bf16.msra.mxu0 %v4268_v46  ;;  %3023 = vmatprep.mubr.bf16.mxu0 %v4668_v5  ;;  %v4363_v46 = vld [vmem:[#allocation2 + $0xa0c] ss:$16 sps:$4 sm:$0xff]  }
 0x206   :  { %3074 = vmatpush1.bf16.msra.mxu1 %v4271_v47  ;;  %3105 = vmatprep.mubr.bf16.mxu1 %v4668_v5  ;;  %v4309_v5 = vld [vmem:[#allocation2 + $0x92c] ss:$16 sps:$4 sm:$0xff]   ;;  %v4358_v47 = vld [vmem:[#allocation2 + $0xa00] ss:$16 sps:$4 sm:$0xff]  }
 0x207   :  { %2993 = vmatprep.subr.bf16.mxu0 %v4276_v48  ;;  %3075 = vmatprep.subr.bf16.mxu1 %v4279_v49  ;;  %v4361_v48 = vld [vmem:[#allocation2 + $0xa08] ss:$16 sps:$4 sm:$0xff]   ;;  %v4366_v49 = vld [vmem:[#allocation2 + $0xbec] ss:$16 sps:$4 sm:$0xff]  }
 0x209   :  { %2994 = vmatpush1.bf16.msra.mxu0 %v4274_v50  ;;  %v4364_v50 = vld [vmem:[#allocation2 + $0xbe8] ss:$16 sps:$4 sm:$0xff]  }
 0x20a   :  { %3076 = vmatpush1.bf16.msra.mxu1 %v4277_v51  ;;  %2995 = vmatprep.subr.bf16.mxu0 %v4282_v52  ;;  %v4369_v51 = vld [vmem:[#allocation2 + $0xbcc] ss:$16 sps:$4 sm:$0xff]   ;;  %v4367_v52 = vld [vmem:[#allocation2 + $0xbc8] ss:$16 sps:$4 sm:$0xff]  }
 0x20b   :  { %3077 = vmatprep.subr.bf16.mxu1 %v4285_v53  ;;  %v4372_v53 = vld [vmem:[#allocation2 + $0xbac] ss:$16 sps:$4 sm:$0xff]  }
 0x20d   :  { %2996 = vmatpush1.bf16.msra.mxu0 %v4280_v37  ;;  %v4370_v37 = vld [vmem:[#allocation2 + $0xba8] ss:$16 sps:$4 sm:$0xff]  }
 0x20e   :  { %3078 = vmatpush1.bf16.msra.mxu1 %v4283_v54  ;;  %2997 = vmatprep.subr.bf16.mxu0 %v4288_v39  ;;  %v4375_v54 = vld [vmem:[#allocation2 + $0xb8c] ss:$16 sps:$4 sm:$0xff]   ;;  %v4373_v39 = vld [vmem:[#allocation2 + $0xb88] ss:$16 sps:$4 sm:$0xff]  }
 0x20f   :  { %3079 = vmatprep.subr.bf16.mxu1 %v4291_v55  ;;  %v4378_v55 = vld [vmem:[#allocation2 + $0xb6c] ss:$16 sps:$4 sm:$0xff]  }
 0x211   :  { %2998 = vmatpush1.bf16.msra.mxu0 %v4286_v56  ;;  %v4376_v56 = vld [vmem:[#allocation2 + $0xb68] ss:$16 sps:$4 sm:$0xff]  }
 0x212   :  { %3080 = vmatpush1.bf16.msra.mxu1 %v4289_v57  ;;  %2999 = vmatprep.subr.bf16.mxu0 %v4294_v58  ;;  %v4381_v57 = vld [vmem:[#allocation2 + $0xb4c] ss:$16 sps:$4 sm:$0xff]  }
 0x213   :  { %3081 = vmatprep.subr.bf16.mxu1 %v4297_v59  ;;  %v4384_v58 = vld [vmem:[#allocation2 + $0xb2c] ss:$16 sps:$4 sm:$0xff]   ;;  %v4382_v59 = vld [vmem:[#allocation2 + $0xb28] ss:$16 sps:$4 sm:$0xff]  }
 0x215   :  { %3000 = vmatpush1.bf16.msra.mxu0 %v4292_v60  ;;  %v4385_v60 = vld [vmem:[#allocation2 + $0xb08] ss:$16 sps:$4 sm:$0xff]  }
 0x216   :  { %3082 = vmatpush1.bf16.msra.mxu1 %v4295_v61  ;;  %3001 = vmatprep.subr.bf16.mxu0 %v4300_v62  ;;  %v1732_v61 = vld [vmem:[#allocation4 + $0x40] sm:$0xff] }
 0x217   :  { %3083 = vmatprep.subr.bf16.mxu1 %v4303_v63 }
 0x219   :  { %3002 = vmatpush1.bf16.msra.mxu0 %v4298_v2  ;;  %v1733_v2 = vld [vmem:[#allocation4 + $0x48] sm:$0xff] }
 0x21a   :  { %3084 = vmatpush1.bf16.msra.mxu1 %v4301_v3  ;;  %3003 = vmatprep.subr.bf16.mxu0 %v4306_v4 }
 0x21b   :  { %3085 = vmatprep.subr.bf16.mxu1 %v4309_v5 }
 0x21d   :  { %3004 = vmatpush1.bf16.msra.mxu0 %v4304_v6 }
 0x21e   :  { %3086 = vmatpush1.bf16.msra.mxu1 %v4307_v7  ;;  %3005 = vmatprep.subr.bf16.mxu0 %v4312_v10 }
 0x21f   :  { %3087 = vmatprep.subr.bf16.mxu1 %v4315_v11 }
 0x221   :  { %3006 = vmatpush1.bf16.msra.mxu0 %v4310_v13 }
 0x222   :  { %3088 = vmatpush1.bf16.msra.mxu1 %v4313_v14  ;;  %3007 = vmatprep.subr.bf16.mxu0 %v4318_v16 }
 0x223   :  { %3089 = vmatprep.subr.bf16.mxu1 %v4321_v17 }
 0x225   :  { %3008 = vmatpush2.bf16.msra.mxu0 %v4316_v19  ;;  %v4388_v19 = vld [vmem:[#allocation6 + $0x78] sm:$0xff]  }
 0x226   :  { %3090 = vmatpush2.bf16.msra.mxu1 %v4319_v20  ;;  %3009 = vmatprep.subr.bf16.mxu0 %v4324_v21  ;;  %v4390_v21 = vld [vmem:[#allocation6 + $0x70] sm:$0xff]  }
 0x227   :  { %3091 = vmatprep.subr.bf16.mxu1 %v4327_v22  ;;  %v4391_v22 = vld [vmem:[#allocation6 + $0x30] sm:$0xff]  }
 0x229   :  { %3010 = vmatpush2.bf16.msra.mxu0 %v4322_v23  ;;  %v4392_v23 = vld [vmem:[#allocation6 + $0x68] sm:$0xff]  }
 0x22a   :  { %3092 = vmatpush2.bf16.msra.mxu1 %v4325_v9  ;;  %3011 = vmatprep.subr.bf16.mxu0 %v4330_v15  ;;  %v4393_v9 = vld [vmem:[#allocation6 + $0x28] sm:$0xff]   ;;  %v4396_v15 = vld [vmem:[#allocation6 + $0x58] sm:$0xff]  }
 0x22b   :  { %3093 = vmatprep.subr.bf16.mxu1 %v4333_v24  ;;  %v4397_v24 = vld [vmem:[#allocation6 + $0x18] sm:$0xff]  }
 0x22d   :  { %3012 = vmatpush2.bf16.msra.mxu0 %v4328_v25  ;;  %v4398_v25 = vld [vmem:[#allocation6 + $0x50] sm:$0xff]  }
 0x22e   :  { %3094 = vmatpush2.bf16.msra.mxu1 %v4331_v26  ;;  %3013 = vmatprep.subr.bf16.mxu0 %v4336_v27 }
 0x22f   :  { %3095 = vmatprep.subr.bf16.mxu1 %v4339_v28  ;;  %v1734_v28 = vld [vmem:[#allocation4 + $0x50] sm:$0xff] }
 0x231   :  { %3014 = vmatpush2.bf16.msra.mxu0 %v4334_v29  ;;  %v4399_v29 = vld [vmem:[#allocation6 + $0x10] sm:$0xff]  }
 0x232   :  { %3096 = vmatpush2.bf16.msra.mxu1 %v4337_v30  ;;  %3015 = vmatprep.subr.bf16.mxu0 %v4342_v31  ;;  %v4400_v31 = vld [vmem:[#allocation6 + $0x48] sm:$0xff]  }
 0x233   :  { %3097 = vmatprep.subr.bf16.mxu1 %v4345_v32 }
 0x235   :  { %3016 = vmatpush2.bf16.msra.mxu0 %v4340_v33  ;;  %v1735_v33 = vld [vmem:[#allocation4 + $0x58] sm:$0xff] }
 0x236   :  { %3098 = vmatpush2.bf16.msra.mxu1 %v4343_v34  ;;  %3017 = vmatprep.subr.bf16.mxu0 %v4348_v1 }
 0x237   :  { %3099 = vmatprep.subr.bf16.mxu1 %v4351_v35 }
 0x239   :  { %3018 = vmatpush2.bf16.msra.mxu0 %v4346_v36  ;;  %v4401_v36 = vld [vmem:[#allocation6 + $0x8] sm:$0xff]  }
 0x23a   :  { %3100 = vmatpush2.bf16.msra.mxu1 %v4349_v38  ;;  %3019 = vmatprep.subr.bf16.mxu0 %v4354_v40 }
 0x23b   :  { %3101 = vmatprep.subr.bf16.mxu1 %v4357_v41  ;;  %v4402_v41 = vld [vmem:[#allocation6 + $0x40] sm:$0xff]  }
 0x23d   :  { %3020 = vmatpush2.bf16.msra.mxu0 %v4352_v42 }
 0x23e   :  { %3102 = vmatpush2.bf16.msra.mxu1 %v4355_v43  ;;  %3021 = vmatprep.subr.bf16.mxu0 %v4360_v44 }
 0x23f   :  { %3103 = vmatprep.subr.bf16.mxu1 %v4363_v46 }
 0x241   :  { %3022 = vmatpush2.bf16.msra.mxu0 %v4358_v47 }
 0x242   :  { %3104 = vmatpush2.bf16.msra.mxu1 %v4361_v48  ;;  %3114 = vmatprep.subr.bf16.mxu0 %v4366_v49  ;;  %v4403_v48 = vld [vmem:[#allocation6] sm:$0xff]  }
 0x244   :  { %3024 = vmatmul.mubr.bf16.vlgmr.msra.gmra.mxu0 %v4670_v8 }
 0x245   :  { %3106 = vmatmul.mubr.bf16.vlgmr.msra.gmra.mxu1 %v4670_v8  ;;  %3115 = vmatpush1.bf16.msra.mxu0 %v4364_v50  ;;  %v4379_v8 = vld [vmem:[#allocation2 + $0xb48] ss:$16 sps:$4 sm:$0xff]  }
 0x246   :  { %3116 = vmatprep.subr.bf16.mxu0 %v4369_v51  ;;  %3146 = vmatprep.mubr.bf16.mxu0 %v4564_v0  ;;  %v4387_v0 = vld [vmem:[#allocation2 + $0xb0c] ss:$16 sps:$4 sm:$0xff]  }
 0x249   :  { %3117 = vmatpush1.bf16.msra.mxu0 %v4367_v52 }
 0x24a   :  { %3118 = vmatprep.subr.bf16.mxu0 %v4372_v53  ;;  %v3660_v53 = vld [vmem:[%s4708_s2 + $0x10] sm:$0xff] }
 0x24d   :  { %3119 = vmatpush1.bf16.msra.mxu0 %v4370_v37 }
 0x24e   :  { %3120 = vmatprep.subr.bf16.mxu0 %v4375_v54 }
 0x251   :  { %3121 = vmatpush1.bf16.msra.mxu0 %v4373_v39 }
 0x252   :  { %3122 = vmatprep.subr.bf16.mxu0 %v4378_v55 }
 0x255   :  { %3123 = vmatpush1.bf16.msra.mxu0 %v4376_v56 }
 0x256   :  { %3124 = vmatprep.subr.bf16.mxu0 %v4381_v57 }
 0x259   :  { %3125 = vmatpush1.bf16.msra.mxu0 %v4379_v8 }
 0x25a   :  { %3126 = vmatprep.subr.bf16.mxu0 %v4384_v58 }
 0x25d   :  { %3127 = vmatpush1.bf16.msra.mxu0 %v4382_v59 }
 0x25e   :  { %3128 = vmatprep.subr.bf16.mxu0 %v4387_v0 }
 0x261   :  { %3129 = vmatpush1.bf16.msra.mxu0 %v4385_v60  ;;  %v2507_v60 = vld [vmem:[#allocation4 + $0x60] sm:$0xff] }
 0x262   :  { %3778 = vmatprep.subr.bf16.mxu0 %v4388_v19 }
 0x264   :  { %3147 = vmatmul.mubr.bf16.vlgmr.msra.gmra.mxu0 %v4685_v45  ;;  %v4389_v45 = vld [vmem:[#allocation6 + $0x38] sm:$0xff]  }
 0x265   :  { %3779 = vmatpush3.bf16.msra.mxu0 %v4389_v45  ;;  %v2509_v45 = vld [vmem:[#allocation4 + $0x70] sm:$0xff] }
 0x266   :  { %3780 = vmatprep.subr.bf16.mxu0 %v4390_v21 }
 0x269   :  { %3781 = vmatpush3.bf16.msra.mxu0 %v4391_v22 }
 0x26a   :  { %3782 = vmatprep.subr.bf16.mxu0 %v4392_v23  ;;  %v2510_v23 = vld [vmem:[#allocation4 + $0x78] sm:$0xff] }
 0x26d   :  { %3783 = vmatpush3.bf16.msra.mxu0 %v4393_v9 }
 0x2a4   :  { %v2250_v62 = vpop.f32.mrf.mxu0  ;;  %v2332_v63 = vpop.f32.mrf.mxu1 }
 0x2a5   :  { %v2251_v3 = vadd.f32 %v2250_v62, %v1732_v61  ;;  %v2333_v34 = vadd.f32 %v2332_v63, %v1734_v28  ;;  %v2508_v62 = vld [vmem:[#allocation4 + $0x68] sm:$0xff] }
 0x2a6   :  { %v2252_v4 = vpop.f32.mrf.mxu0  ;;  %v2334_v5 = vpop.f32.mrf.mxu1 }
 0x2a7   :  { %v2253_v6 = vadd.f32 %v2252_v4, %v1733_v2  ;;  %v2292_v13 = vadd.f32 %v4676_v12, %v2251_v3  ;;  %v4395_v12 = vld [vmem:[#allocation6 + $0x20] sm:$0xff]   ;;  %v2335_v38 = vadd.f32 %v2334_v5, %v1735_v33 }
 0x2a8   :  { %v2254_v7 = vpop.f32.mrf.mxu0  ;;  %v2336_v10 = vpop.f32.mrf.mxu1 }
 0x2a9   :  { %v2294_v11 = vadd.f32 %v4678_v18, %v2253_v6  ;;  %v3657_v20 = vmul.f32 -1.442695, %v2292_v13  ;;  %v4394_v18 = vld [vmem:[#allocation6 + $0x60] sm:$0xff]  }
 0x2aa   :  { %v2255_v14 = vpop.f32.mrf.mxu0  ;;  %v2337_v16 = vpop.f32.mrf.mxu1  ;;  %3784 = vmatprep.subr.bf16.mxu0 %v4394_v18 }
 0x2ab   :  { %v3658_v17 = vmul.f32 -1.442695, %v2294_v11  ;;  %3785 = vmatpush3.bf16.msra.mxu0 %v4395_v12 }
 0x2ac   :  { %3786 = vmatprep.subr.bf16.mxu0 %v4396_v15 }
 0x2ad   :  { %4436 = vpow2.f32 %v3658_v17 }
 0x2ae   :  { %4438 = vpow2.f32 %v3657_v20 }
 0x2af   :  { %3787 = vmatpush3.bf16.msra.mxu0 %v4397_v24 }
 0x2b0   :  { %3788 = vmatprep.subr.bf16.mxu0 %v4398_v25 }
 0x2b3   :  { %3789 = vmatpush3.bf16.msra.mxu0 %v4399_v29 }
 0x2b4   :  { %3790 = vmatprep.subr.bf16.mxu0 %v4400_v31 }
 0x2b7   :  { %3791 = vmatpush3.bf16.msra.mxu0 %v4401_v36 }
 0x2b8   :  { %3792 = vmatprep.subr.bf16.mxu0 %v4402_v41 }
 0x2ba   :  { %v4437_v26 = vpop.eup %4436 }
 0x2bb   :  { %v4439_v27 = vpop.eup %4438  ;;  %v2389_v30 = vadd.f32 1.0, %v4437_v26  ;;  %3793 = vmatpush3.bf16.msra.mxu0 %v4403_v48 }
 0x2bc   :  { %v2383_v32 = vadd.f32 1.0, %v4439_v27 }
 0x2bd   :  { %4440 = vrcp.f32 %v2389_v30  ;;  %v3761_v30 = vld [vmem:[%s4708_s2 + $0x18] sm:$0xff] }
 0x2be   :  { %4442 = vrcp.f32 %v2383_v32 }
 0x2c4   :  { %v2373_v1 = vpop.f32.mrf.mxu0  ;;  %v3066_v35 = vpop.f32.mrf.mxu1 }
 0x2c5   :  { %v2374_v40 = vadd.f32 %v2373_v1, %v2333_v34 }
 0x2c6   :  { %v2375_v42 = vpop.f32.mrf.mxu0  ;;  %v3068_v43 = vpop.f32.mrf.mxu1 }
 0x2c7   :  { %4444 = vtanh.f32 %v2374_v40  ;;  %v2376_v44 = vadd.f32 %v2375_v42, %v2335_v38 }
 0x2c8   :  { %v2377_v46 = vpop.f32.mrf.mxu0  ;;  %v3070_v47 = vpop.f32.mrf.mxu1 }
 0x2c9   :  { %v3659_v49 = vmul.f32 -1.442695, %v2376_v44  ;;  %v3215_v46 = vld [vmem:[#allocation7] sm:$0xff] }
 0x2ca   :  { %v2378_v50 = vpop.f32.mrf.mxu0  ;;  %v3071_v51 = vpop.f32.mrf.mxu1 }
 0x2cb   :  { %4446 = vpow2.f32 %v3659_v49  ;;  %v4441_v52 = vpop.eup %4440 }
 0x2cc   :  { %v4443_v37 = vpop.eup %4442  ;;  %v2401_v39 = vmul.f32 %v4441_v52, %v3660_v53 }
 0x2d4   :  { %v4445_v54 = vpop.eup %4444 }
 0x2d5   :  { %v2402_v55 = vmul.f32 %v4445_v54, %v4443_v37 }
 0x2d7   :  { %v2403_v56 = vadd.f32 %v2402_v55, %v2401_v39 }
 0x2d8   :  { %v4447_v57 = vpop.eup %4446 }
 0x2d9   :  { %v2396_v8 = vadd.f32 1.0, %v4447_v57  ;;  %4448 = vtanh.f32 %v2403_v56 }
 0x2db   :  { %4450 = vrcp.f32 %v2396_v8 }
 0x2e6   :  { %v4449_v58 = vpop.eup %4448 }
 0x2e8   :  { %v4451_v59 = vpop.eup %4450 }
 0x2e9   :  { %v2405_v0 = vmul.f32 %v4451_v59, %v4449_v58 }
 0x304   :  { %v3025_v61 = vpop.f32.mrf.mxu0 }
 0x305   :  { %v3107_v63 = vpop.f32.mrf.mxu1  ;;  %v3026_v2 = vadd.f32 %v3025_v61, %v2507_v60 }
 0x306   :  { %v3027_v3 = vpop.f32.mrf.mxu0  ;;  %v3108_v9 = vadd.f32 %v3107_v63, %v2509_v45 }
 0x307   :  { %v3028_v4 = vadd.f32 %v3027_v3, %v2508_v62  ;;  %v3109_v5 = vpop.f32.mrf.mxu1  ;;  %v3067_v11 = vadd.f32 %v3066_v35, %v3026_v2 }
 0x308   :  { %v3029_v6 = vpop.f32.mrf.mxu0  ;;  %v3110_v12 = vadd.f32 %v3109_v5, %v2510_v23 }
 0x309   :  { %v3069_v7 = vadd.f32 %v3068_v43, %v3028_v4  ;;  %v3111_v10 = vpop.f32.mrf.mxu1  ;;  %v3758_v17 = vmul.f32 -1.442695, %v3067_v11  ;;  %v3181_v43 = vpack.c.bf16 %v2405_v0, %v2405_v0 }
 0x30a   :  { %v3030_v13 = vpop.f32.mrf.mxu0 }
 0x30b   :  { %v3112_v14 = vpop.f32.mrf.mxu1  ;;  %v3759_v16 = vmul.f32 -1.442695, %v3069_v7 }
 0x30d   :  { %4452 = vpow2.f32 %v3759_v16 }
 0x30e   :  { %4454 = vpow2.f32 %v3758_v17 }
 0x31a   :  { %v4453_v19 = vpop.eup %4452 }
 0x31b   :  { %v4455_v20 = vpop.eup %4454  ;;  %v3164_v21 = vadd.f32 1.0, %v4453_v19 }
 0x31c   :  { %v3158_v22 = vadd.f32 1.0, %v4455_v20 }
 0x31d   :  { %4456 = vrcp.f32 %v3164_v21 }
 0x31e   :  { %4458 = vrcp.f32 %v3158_v22 }
 0x324   :  { %v3148_v18 = vpop.f32.mrf.mxu0 }
 0x325   :  { %v3149_v15 = vadd.f32 %v3148_v18, %v3108_v9 }
 0x326   :  { %v3150_v24 = vpop.f32.mrf.mxu0 }
 0x327   :  { %4460 = vtanh.f32 %v3149_v15  ;;  %v3151_v25 = vadd.f32 %v3150_v24, %v3110_v12 }
 0x328   :  { %v3152_v26 = vpop.f32.mrf.mxu0 }
 0x329   :  { %v3760_v27 = vmul.f32 -1.442695, %v3151_v25 }
 0x32a   :  { %v3153_v28 = vpop.f32.mrf.mxu0  ;;  %v4457_v29 = vpop.eup %4456 }
 0x32b   :  { %4462 = vpow2.f32 %v3760_v27  ;;  %v4459_v31 = vpop.eup %4458  ;;  %v3176_v33 = vmul.f32 %v4457_v29, %v3761_v30 }
 0x334   :  { %v4461_v32 = vpop.eup %4460 }
 0x335   :  { %v3177_v34 = vmul.f32 %v4461_v32, %v4459_v31 }
 0x337   :  { %v3178_v1 = vadd.f32 %v3177_v34, %v3176_v33 }
 0x338   :  { %v4463_v35 = vpop.eup %4462 }
 0x339   :  { %v3171_v36 = vadd.f32 1.0, %v4463_v35  ;;  %4464 = vtanh.f32 %v3178_v1 }
 0x33b   :  { %4466 = vrcp.f32 %v3171_v36 }
 0x346   :  { %v4465_v38 = vpop.eup %4464 }
 0x348   :  { %v4467_v40 = vpop.eup %4466 }
 0x349   :  { %v3180_v41 = vmul.f32 %v4467_v40, %v4465_v38 }
 0x34b   :  { %v3182_v42 = vpack.c.bf16 %v3180_v41, %v3180_v41 }
 0x34d   :  { %3344 = vmatprep.mubr.bf16.mxu0 %v3182_v42 }
 0x34e   :  { %3345 = vmatmul.mubr.bf16.vlgmr.msra.gmra.mxu0 %v3181_v43 }
 0x40e   :  { %v3794_v44 = vpop.f32.mrf.mxu0 }
 0x410   :  { %v3795_v47 = vpop.f32.mrf.mxu0 }
 0x411   :  { %v3796_v48 = vadd.f32 %v3795_v47, %v3794_v44 }
 0x412   :  { %v3797_v49 = vpop.f32.mrf.mxu0 }
 0x413   :  { %v3347_v50 = vadd.f32 %v3796_v48, %v3215_v46 }
 0x414   :  { %v3798_v51 = vpop.f32.mrf.mxu0 }
 0x415   :  { %3352 = vst [vmem:[%s4713_s7] sm:$0xff] %v3347_v50 }
 0x416   :  { %3357 = vsyncpa [#allocation3], 1 }
 0x417   :  { %3358 = vsyncpa [#allocation5], 1 }
 0x418   :  { %3359 = vsyncpa [#allocation8], 1 }

</bundles_post_ra>
